<compile_context>
chip_gen: v7x
topology: tpu7x:2x2x1
jax: 0.10.0
libtpu: 0.0.40
codegen_flags: <defaults>
</compile_context>

<pallas_src>
import math

import jax
import jax.numpy as jnp
from jax import lax
from jax.experimental import pallas as pl
from jax.experimental.pallas import tpu as pltpu


# bf16 matmul inputs + f32 accumulation = native MXU throughput on v5e/v6e/v7x
# and halves patch/weight DMA bytes.  Set to jnp.float32 for exact parity with
# the f32 reference (the tolerance in __main__ tightens automatically).
MATMUL_DTYPE = jnp.bfloat16

NUM_CLASSES = 10
_VMEM_LIMIT = 48 * 1024 * 1024   # below v7x's 64 MiB physical VMEM per core


# ----------------------------------------------------------------------------
# Pallas kernels
# ----------------------------------------------------------------------------
def conv_relu_pool_kernel(p_ref, w_ref, b_ref, o_ref):
    """Fused conv(one matmul) + bias + ReLU + 2x2/2 maxpool for a batch tile.

    p_ref: (Bt, 4, R, K)  im2col patches; axis 1 = pool-window position
    w_ref: (K, Cout)      conv weights, rows ordered (kh, kw, cin)
    b_ref: (1, Cout)      f32 bias
    o_ref: (Bt, R, Cout)  pooled output, R rows ordered (oh2, ow2)
    """
    Bt, _, R, K = p_ref.shape
    Cout = w_ref.shape[1]
    # One MXU push chain over all batch rows and all 4 pool positions.
    p = p_ref[...].reshape(Bt * 4 * R, K)
    a = jnp.dot(p, w_ref[...], preferred_element_type=jnp.float32)
    a = jnp.maximum(a + b_ref[...], 0.0)
    a = a.reshape(Bt, 4, R, Cout)
    # 2x2 max-pool = elementwise max over the 4 pool-window positions (VPU).
    o_ref[...] = jnp.maximum(jnp.maximum(a[:, 0], a[:, 1]),
                             jnp.maximum(a[:, 2], a[:, 3]))


def mlp_kernel(x_ref, w1_ref, b1_ref, w2_ref, b2_ref, w3_ref, b3_ref, o_ref):
    # Fused Linear(256,120)+ReLU -> Linear(120,84)+ReLU -> Linear(84,128pad)
    h = jnp.dot(x_ref[...], w1_ref[...], preferred_element_type=jnp.float32)
    h = jnp.maximum(h + b1_ref[...], 0.0)
    h = jnp.dot(h.astype(MATMUL_DTYPE), w2_ref[...],
                preferred_element_type=jnp.float32)
    h = jnp.maximum(h + b2_ref[...], 0.0)
    h = jnp.dot(h.astype(MATMUL_DTYPE), w3_ref[...],
                preferred_element_type=jnp.float32)
    o_ref[...] = h + b3_ref[...]


# ----------------------------------------------------------------------------
# Wrappers (im2col glue stays in plain JAX; one fusion feeding each call)
# ----------------------------------------------------------------------------
def _pool_grouped_patches(x_nhwc, KH, KW):
    """im2col in pool-grouped layout, built directly with strided slices.

    Returns (N, 4, R, K): axis 1 indexes the 2x2 pool-window position (wr,wc),
    R = (OH//2)*(OW//2) rows in (oh2, ow2) order, K features ordered
    (kh, kw, cin).  No separate transpose pass is materialized in HBM.
    """
    N, H, W, C = x_nhwc.shape
    OH, OW = H - KH + 1, W - KW + 1
    OH2, OW2 = OH // 2, OW // 2
    xq = x_nhwc.astype(MATMUL_DTYPE)
    groups = []
    for wr in (0, 1):
        for wc in (0, 1):
            feats = [xq[:, wr + kh: wr + kh + 2 * OH2: 2,
                        wc + kw: wc + kw + 2 * OW2: 2, :]
                     for kh in range(KH) for kw in range(KW)]
            g = jnp.concatenate(feats, axis=-1)              # (N, OH2, OW2, K)
            groups.append(g.reshape(N, OH2 * OW2, KH * KW * C))
    return jnp.stack(groups, axis=1)                         # (N, 4, R, K)


def conv_relu_pool(x_nhwc, wk, bk, *, batch_tile, KH=5, KW=5):
    """x: (N, H, W, Cin) channels-last; wk: (KH*KW*Cin, Cout); bk: (1, Cout).

    Returns pooled, ReLU'd conv output as (N, OH//2, OW//2, Cout).
    """
    N, H, W, C = x_nhwc.shape
    OH2, OW2 = (H - KH + 1) // 2, (W - KW + 1) // 2
    R = OH2 * OW2
    K, Cout = wk.shape

    p = _pool_grouped_patches(x_nhwc, KH, KW)                # (N, 4, R, K) bf16
    Bt = min(N, batch_tile)
    grid = (pl.cdiv(N, Bt),)

    flops = 2 * N * 4 * R * K * Cout
    bytes_accessed = (p.size * p.dtype.itemsize + wk.size * wk.dtype.itemsize
                      + bk.size * 4 + N * R * Cout * 4)

    out = pl.pallas_call(
        conv_relu_pool_kernel,
        grid=grid,
        in_specs=[
            pl.BlockSpec((Bt, 4, R, K), lambda n: (n, 0, 0, 0)),
            pl.BlockSpec((K, Cout), lambda n: (0, 0)),
            pl.BlockSpec((1, Cout), lambda n: (0, 0)),
        ],
        out_specs=pl.BlockSpec((Bt, R, Cout), lambda n: (n, 0, 0)),
        out_shape=jax.ShapeDtypeStruct((N, R, Cout), jnp.float32),
        compiler_params=pltpu.CompilerParams(
            dimension_semantics=("parallel",),
            vmem_limit_bytes=_VMEM_LIMIT),
        cost_estimate=pl.CostEstimate(
            flops=flops, transcendentals=0, bytes_accessed=bytes_accessed),
    )(p, wk, bk)

    return out.reshape(N, OH2, OW2, Cout)


def mlp(x, w1, b1, w2, b2, w3, b3):
    """Fused classifier head.  x: (N, 256) -> (N, 128) padded logits."""
    N, D = x.shape
    out_dim = w3.shape[1]                                    # 128 (padded)
    tm = min(N, 512)
    grid = (pl.cdiv(N, tm),)
    xq = x.astype(MATMUL_DTYPE)

    def full2d(a):
        return pl.BlockSpec(a.shape, lambda i: (0, 0))

    flops = 2 * N * (D * w1.shape[1] + w1.shape[1] * w2.shape[1]
                     + w2.shape[1] * out_dim)
    bytes_accessed = (xq.size * xq.dtype.itemsize
                      + (w1.size + w2.size + w3.size) * w1.dtype.itemsize
                      + (b1.size + b2.size + b3.size) * 4 + N * out_dim * 4)

    return pl.pallas_call(
        mlp_kernel,
        grid=grid,
        in_specs=[pl.BlockSpec((tm, D), lambda i: (i, 0)),
                  full2d(w1), full2d(b1), full2d(w2), full2d(b2),
                  full2d(w3), full2d(b3)],
        out_specs=pl.BlockSpec((tm, out_dim), lambda i: (i, 0)),
        out_shape=jax.ShapeDtypeStruct((N, out_dim), jnp.float32),
        compiler_params=pltpu.CompilerParams(
            dimension_semantics=("parallel",),
            vmem_limit_bytes=_VMEM_LIMIT),
        cost_estimate=pl.CostEstimate(
            flops=flops, transcendentals=0, bytes_accessed=bytes_accessed),
    )(xq, w1, b1, w2, b2, w3, b3)


def lenet_forward(x, pp, num_classes=NUM_CLASSES):
    """LeNet forward.  x: (N, 1, 28, 28) NCHW float32 -> (N, num_classes)."""
    N = x.shape[0]
    x_nhwc = jnp.transpose(x, (0, 2, 3, 1))                  # free: Cin == 1
    y = conv_relu_pool(x_nhwc, pp["w_c1"], pp["b_c1"], batch_tile=32)   # (N,12,12,6)
    y = conv_relu_pool(y, pp["w_c2"], pp["b_c2"], batch_tile=128)       # (N,4,4,16)
    # (h, w, c)-order flatten; fc1 rows were pre-permuted to match PyTorch's
    # (c, h, w) flatten, so no activation transpose is needed here.
    y = y.reshape(N, 4 * 4 * 16)
    logits = mlp(y, pp["w_f1"], pp["b_f1"], pp["w_f2"], pp["b_f2"],
                 pp["w_f3"], pp["b_f3"])                     # (N, 128) padded
    return logits[:, :num_classes]


# ----------------------------------------------------------------------------
# Parameters: PyTorch-style init + one-time kernel-layout preparation
# ----------------------------------------------------------------------------
def init_params(key, num_classes=NUM_CLASSES):
    ks = jax.random.split(key, 10)

    def u(k, shape, fan_in):
        bound = 1.0 / math.sqrt(fan_in)
        return jax.random.uniform(k, shape, jnp.float32, -bound, bound)

    return {
        "w_c1": u(ks[0], (6, 1, 5, 5), 1 * 5 * 5),
        "b_c1": u(ks[1], (6,), 1 * 5 * 5),
        "w_c2": u(ks[2], (16, 6, 5, 5), 6 * 5 * 5),
        "b_c2": u(ks[3], (16,), 6 * 5 * 5),
        # Linear weights stored as (in, out); equivalent to PyTorch (out, in).T
        "w_f1": u(ks[4], (16 * 4 * 4, 120), 16 * 4 * 4),
        "b_f1": u(ks[5], (120,), 16 * 4 * 4),
        "w_f2": u(ks[6], (120, 84), 120),
        "b_f2": u(ks[7], (84,), 120),
        "w_f3": u(ks[8], (84, num_classes), 84),
        "b_f3": u(ks[9], (num_classes,), 84),                # fixed shape bug
    }


def prepare_params(p, pad_logits_to=128):
    """One-time reshapes / permutations / casts into kernel layouts."""
    def conv_prep(w):
        # (Cout, Cin, KH, KW) -> (KH*KW*Cin, Cout), rows ordered (kh, kw, cin)
        Cout, Cin, KH, KW = w.shape
        return (jnp.transpose(w, (2, 3, 1, 0))
                .reshape(KH * KW * Cin, Cout).astype(MATMUL_DTYPE))

    # fc1 rows: PyTorch flatten order (c, h, w) -> our channels-last (h, w, c).
    w_f1 = (p["w_f1"].reshape(16, 4, 4, -1)
                     .transpose(1, 2, 0, 3)
                     .reshape(16 * 4 * 4, -1))

    # Pad the classifier output dim to 128 lanes (unmasked stores); logits are
    # sliced back to num_classes outside the kernel.
    out_dim = p["w_f3"].shape[1]
    pad = pad_logits_to - out_dim
    w_f3 = jnp.pad(p["w_f3"], ((0, 0), (0, pad)))
    b_f3 = jnp.pad(p["b_f3"], (0, pad))

    return {
        "w_c1": conv_prep(p["w_c1"]), "b_c1": p["b_c1"].reshape(1, -1),
        "w_c2": conv_prep(p["w_c2"]), "b_c2": p["b_c2"].reshape(1, -1),
        "w_f1": w_f1.astype(MATMUL_DTYPE), "b_f1": p["b_f1"].reshape(1, -1),
        "w_f2": p["w_f2"].astype(MATMUL_DTYPE), "b_f2": p["b_f2"].reshape(1, -1),
        "w_f3": w_f3.astype(MATMUL_DTYPE), "b_f3": b_f3.reshape(1, -1),
    }


# ----------------------------------------------------------------------------
# Pure-JAX f32 reference (operates on the raw PyTorch-layout params)
# ----------------------------------------------------------------------------
def ref_forward(x, p):
    dn = ("NCHW", "OIHW", "NCHW")
    y = lax.conv_general_dilated(x, p["w_c1"], (1, 1), "VALID", dimension_numbers=dn)
    y = jnp.maximum(y + p["b_c1"].reshape(1, -1, 1, 1), 0.0)
    y = lax.reduce_window(y, -jnp.inf, lax.max, (1, 1, 2, 2), (1, 1, 2, 2), "VALID")
    y = lax.conv_general_dilated(y, p["w_c2"], (1, 1), "VALID", dimension_numbers=dn)
    y = jnp.maximum(y + p["b_c2"].reshape(1, -1, 1, 1), 0.0)
    y = lax.reduce_window(y, -jnp.inf, lax.max, (1, 1, 2, 2), (1, 1, 2, 2), "VALID")
    y = y.reshape(y.shape[0], -1)                            # (c, h, w) flatten
    y = jnp.maximum(y @ p["w_f1"] + p["b_f1"], 0.0)
    y = jnp.maximum(y @ p["w_f2"] + p["b_f2"], 0.0)
    return y @ p["w_f3"] + p["b_f3"]


if __name__ == "__main__":
    # LeNet's Linear(16*4*4, 120) implies 28x28 single-channel inputs.
    key = jax.random.PRNGKey(0)
    kx, kp = jax.random.split(key)
    x = jax.random.normal(kx, (2, 1, 28, 28), jnp.float32)
    raw_params = init_params(kp)
    params = prepare_params(raw_params)

    fwd = jax.jit(lenet_forward)
    out = jax.block_until_ready(fwd(x, params))

    ref = ref_forward(x, raw_params)
    assert out.shape == (2, NUM_CLASSES), out.shape
    # Tolerance loosened for bf16 matmul inputs (f32 accumulation); set
    # MATMUL_DTYPE = jnp.float32 above for exact parity at 1e-4.
    tol = 1e-4 if MATMUL_DTYPE == jnp.float32 else 5e-2
    err = float(jnp.max(jnp.abs(out - ref)))
    assert err < tol, f"max abs err {err} vs tol {tol}"

    print("KERNEL_OK")
</pallas_src>

<mosaic_0001>
module attributes {stable_mosaic.version = 11 : i64} {
  func.func @conv_relu_pool_kernel(%arg0: i32, %arg1: memref<2x4x144x25xbf16, #tpu.memory_space<vmem>>, %arg2: memref<25x6xbf16, #tpu.memory_space<vmem>>, %arg3: memref<1x6xf32, #tpu.memory_space<vmem>>, %arg4: memref<2x144x6xf32, #tpu.memory_space<vmem>>) attributes {dimension_semantics = [#tpu.dimension_semantics<parallel>], iteration_bounds = array<i64: 1>, scalar_prefetch = 0 : i64, scratch_operands = 0 : i64, tpu.core_type = #tpu.core_type<tc>, window_params = [{transform_indices = @transform_0, window_bounds = array<i64: 2, 4, 144, 25>}, {pipeline_mode = #tpu.pipeline_mode<synchronous>, transform_indices = @transform_1, window_bounds = array<i64: 25, 6>}, {pipeline_mode = #tpu.pipeline_mode<synchronous>, transform_indices = @transform_2, window_bounds = array<i64: 1, 6>}, {transform_indices = @transform_3, window_bounds = array<i64: 2, 144, 6>}]} {
    %c0 = arith.constant 0 : index
    %c0_0 = arith.constant 0 : index
    %c0_1 = arith.constant 0 : index
    %c0_2 = arith.constant 0 : index
    %0 = vector.load %arg1[%c0, %c0_0, %c0_1, %c0_2] : memref<2x4x144x25xbf16, #tpu.memory_space<vmem>>, vector<2x4x144x25xbf16>
    %1 = vector.shape_cast %0 : vector<2x4x144x25xbf16> to vector<1152x25xbf16>
    %c0_3 = arith.constant 0 : index
    %c0_4 = arith.constant 0 : index
    %2 = vector.load %arg2[%c0_3, %c0_4] : memref<25x6xbf16, #tpu.memory_space<vmem>>, vector<25x6xbf16>
    %cst = arith.constant dense<0.000000e+00> : vector<1152x6xf32>
    %3 = tpu.matmul %1, %2, %cst {dimension_numbers = #tpu.dot_dimension_numbers<[1], [0], [0], [1], [0, 0, 1, 1], [], []>} : vector<1152x25xbf16>, vector<25x6xbf16>, vector<1152x6xf32> -> vector<1152x6xf32>
    %c0_5 = arith.constant 0 : index
    %c0_6 = arith.constant 0 : index
    %4 = vector.load %arg3[%c0_5, %c0_6] : memref<1x6xf32, #tpu.memory_space<vmem>>, vector<1x6xf32>
    %5 = vector.broadcast %4 : vector<1x6xf32> to vector<1152x6xf32>
    %6 = arith.addf %3, %5 : vector<1152x6xf32>
    %cst_7 = arith.constant 0.000000e+00 : f32
    %7 = vector.broadcast %cst_7 : f32 to vector<1152x6xf32>
    %8 = arith.maximumf %6, %7 : vector<1152x6xf32>
    %9 = vector.shape_cast %8 : vector<1152x6xf32> to vector<2x4x144x6xf32>
    %10 = vector.extract_strided_slice %9 {offsets = [0, 0, 0, 0], sizes = [2, 1, 144, 6], strides = [1, 1, 1, 1]} : vector<2x4x144x6xf32> to vector<2x1x144x6xf32>
    %11 = vector.shape_cast %10 : vector<2x1x144x6xf32> to vector<2x144x6xf32>
    %12 = vector.extract_strided_slice %9 {offsets = [0, 1, 0, 0], sizes = [2, 1, 144, 6], strides = [1, 1, 1, 1]} : vector<2x4x144x6xf32> to vector<2x1x144x6xf32>
    %13 = vector.shape_cast %12 : vector<2x1x144x6xf32> to vector<2x144x6xf32>
    %14 = arith.maximumf %11, %13 : vector<2x144x6xf32>
    %15 = vector.extract_strided_slice %9 {offsets = [0, 2, 0, 0], sizes = [2, 1, 144, 6], strides = [1, 1, 1, 1]} : vector<2x4x144x6xf32> to vector<2x1x144x6xf32>
    %16 = vector.shape_cast %15 : vector<2x1x144x6xf32> to vector<2x144x6xf32>
    %17 = vector.extract_strided_slice %9 {offsets = [0, 3, 0, 0], sizes = [2, 1, 144, 6], strides = [1, 1, 1, 1]} : vector<2x4x144x6xf32> to vector<2x1x144x6xf32>
    %18 = vector.shape_cast %17 : vector<2x1x144x6xf32> to vector<2x144x6xf32>
    %19 = arith.maximumf %16, %18 : vector<2x144x6xf32>
    %20 = arith.maximumf %14, %19 : vector<2x144x6xf32>
    %c0_8 = arith.constant 0 : index
    %c0_9 = arith.constant 0 : index
    %c0_10 = arith.constant 0 : index
    %21 = vector.load %arg4[%c0_8, %c0_9, %c0_10] : memref<2x144x6xf32, #tpu.memory_space<vmem>>, vector<2x144x6xf32>
    tpu.vector_store %arg4[%c0_8, %c0_9, %c0_10], %20 {strides = array<i32>} : memref<2x144x6xf32, #tpu.memory_space<vmem>>, vector<2x144x6xf32>,
    return
  }
  func.func @transform_0(%arg0: i32) -> (i32, i32, i32, i32) {
    %c0_i32 = arith.constant 0 : i32
    %c0_i32_0 = arith.constant 0 : i32
    %c0_i32_1 = arith.constant 0 : i32
    %c0_i32_2 = arith.constant 0 : i32
    return %arg0, %c0_i32, %c0_i32_0, %c0_i32_1 : i32, i32, i32, i32
  }
  func.func @transform_1(%arg0: i32) -> (i32, i32) {
    %c0_i32 = arith.constant 0 : i32
    %c0_i32_0 = arith.constant 0 : i32
    %c0_i32_1 = arith.constant 0 : i32
    return %c0_i32, %c0_i32_0 : i32, i32
  }
  func.func @transform_2(%arg0: i32) -> (i32, i32) {
    %c0_i32 = arith.constant 0 : i32
    %c0_i32_0 = arith.constant 0 : i32
    %c0_i32_1 = arith.constant 0 : i32
    return %c0_i32, %c0_i32_0 : i32, i32
  }
  func.func @transform_3(%arg0: i32) -> (i32, i32, i32) {
    %c0_i32 = arith.constant 0 : i32
    %c0_i32_0 = arith.constant 0 : i32
    %c0_i32_1 = arith.constant 0 : i32
    return %arg0, %c0_i32, %c0_i32_0 : i32, i32, i32
  }
}

module attributes {stable_mosaic.version = 11 : i64} {
  func.func @conv_relu_pool_kernel(%arg0: i32, %arg1: memref<2x4x16x150xbf16, #tpu.memory_space<vmem>>, %arg2: memref<150x16xbf16, #tpu.memory_space<vmem>>, %arg3: memref<1x16xf32, #tpu.memory_space<vmem>>, %arg4: memref<2x16x16xf32, #tpu.memory_space<vmem>>) attributes {dimension_semantics = [#tpu.dimension_semantics<parallel>], iteration_bounds = array<i64: 1>, scalar_prefetch = 0 : i64, scratch_operands = 0 : i64, tpu.core_type = #tpu.core_type<tc>, window_params = [{transform_indices = @transform_0, window_bounds = array<i64: 2, 4, 16, 150>}, {pipeline_mode = #tpu.pipeline_mode<synchronous>, transform_indices = @transform_1, window_bounds = array<i64: 150, 16>}, {pipeline_mode = #tpu.pipeline_mode<synchronous>, transform_indices = @transform_2, window_bounds = array<i64: 1, 16>}, {transform_indices = @transform_3, window_bounds = array<i64: 2, 16, 16>}]} {
    %c0 = arith.constant 0 : index
    %c0_0 = arith.constant 0 : index
    %c0_1 = arith.constant 0 : index
    %c0_2 = arith.constant 0 : index
    %0 = vector.load %arg1[%c0, %c0_0, %c0_1, %c0_2] : memref<2x4x16x150xbf16, #tpu.memory_space<vmem>>, vector<2x4x16x150xbf16>
    %1 = vector.shape_cast %0 : vector<2x4x16x150xbf16> to vector<128x150xbf16>
    %c0_3 = arith.constant 0 : index
    %c0_4 = arith.constant 0 : index
    %2 = vector.load %arg2[%c0_3, %c0_4] : memref<150x16xbf16, #tpu.memory_space<vmem>>, vector<150x16xbf16>
    %cst = arith.constant dense<0.000000e+00> : vector<128x16xf32>
    %3 = tpu.matmul %1, %2, %cst {dimension_numbers = #tpu.dot_dimension_numbers<[1], [0], [0], [1], [0, 0, 1, 1], [], []>} : vector<128x150xbf16>, vector<150x16xbf16>, vector<128x16xf32> -> vector<128x16xf32>
    %c0_5 = arith.constant 0 : index
    %c0_6 = arith.constant 0 : index
    %4 = vector.load %arg3[%c0_5, %c0_6] : memref<1x16xf32, #tpu.memory_space<vmem>>, vector<1x16xf32>
    %5 = vector.broadcast %4 : vector<1x16xf32> to vector<128x16xf32>
    %6 = arith.addf %3, %5 : vector<128x16xf32>
    %cst_7 = arith.constant 0.000000e+00 : f32
    %7 = vector.broadcast %cst_7 : f32 to vector<128x16xf32>
    %8 = arith.maximumf %6, %7 : vector<128x16xf32>
    %9 = vector.shape_cast %8 : vector<128x16xf32> to vector<2x4x16x16xf32>
    %10 = vector.extract_strided_slice %9 {offsets = [0, 0, 0, 0], sizes = [2, 1, 16, 16], strides = [1, 1, 1, 1]} : vector<2x4x16x16xf32> to vector<2x1x16x16xf32>
    %11 = vector.shape_cast %10 : vector<2x1x16x16xf32> to vector<2x16x16xf32>
    %12 = vector.extract_strided_slice %9 {offsets = [0, 1, 0, 0], sizes = [2, 1, 16, 16], strides = [1, 1, 1, 1]} : vector<2x4x16x16xf32> to vector<2x1x16x16xf32>
    %13 = vector.shape_cast %12 : vector<2x1x16x16xf32> to vector<2x16x16xf32>
    %14 = arith.maximumf %11, %13 : vector<2x16x16xf32>
    %15 = vector.extract_strided_slice %9 {offsets = [0, 2, 0, 0], sizes = [2, 1, 16, 16], strides = [1, 1, 1, 1]} : vector<2x4x16x16xf32> to vector<2x1x16x16xf32>
    %16 = vector.shape_cast %15 : vector<2x1x16x16xf32> to vector<2x16x16xf32>
    %17 = vector.extract_strided_slice %9 {offsets = [0, 3, 0, 0], sizes = [2, 1, 16, 16], strides = [1, 1, 1, 1]} : vector<2x4x16x16xf32> to vector<2x1x16x16xf32>
    %18 = vector.shape_cast %17 : vector<2x1x16x16xf32> to vector<2x16x16xf32>
    %19 = arith.maximumf %16, %18 : vector<2x16x16xf32>
    %20 = arith.maximumf %14, %19 : vector<2x16x16xf32>
    %c0_8 = arith.constant 0 : index
    %c0_9 = arith.constant 0 : index
    %c0_10 = arith.constant 0 : index
    %21 = vector.load %arg4[%c0_8, %c0_9, %c0_10] : memref<2x16x16xf32, #tpu.memory_space<vmem>>, vector<2x16x16xf32>
    tpu.vector_store %arg4[%c0_8, %c0_9, %c0_10], %20 {strides = array<i32>} : memref<2x16x16xf32, #tpu.memory_space<vmem>>, vector<2x16x16xf32>,
    return
  }
  func.func @transform_0(%arg0: i32) -> (i32, i32, i32, i32) {
    %c0_i32 = arith.constant 0 : i32
    %c0_i32_0 = arith.constant 0 : i32
    %c0_i32_1 = arith.constant 0 : i32
    %c0_i32_2 = arith.constant 0 : i32
    return %arg0, %c0_i32, %c0_i32_0, %c0_i32_1 : i32, i32, i32, i32
  }
  func.func @transform_1(%arg0: i32) -> (i32, i32) {
    %c0_i32 = arith.constant 0 : i32
    %c0_i32_0 = arith.constant 0 : i32
    %c0_i32_1 = arith.constant 0 : i32
    return %c0_i32, %c0_i32_0 : i32, i32
  }
  func.func @transform_2(%arg0: i32) -> (i32, i32) {
    %c0_i32 = arith.constant 0 : i32
    %c0_i32_0 = arith.constant 0 : i32
    %c0_i32_1 = arith.constant 0 : i32
    return %c0_i32, %c0_i32_0 : i32, i32
  }
  func.func @transform_3(%arg0: i32) -> (i32, i32, i32) {
    %c0_i32 = arith.constant 0 : i32
    %c0_i32_0 = arith.constant 0 : i32
    %c0_i32_1 = arith.constant 0 : i32
    return %arg0, %c0_i32, %c0_i32_0 : i32, i32, i32
  }
}

module attributes {stable_mosaic.version = 11 : i64} {
  func.func @mlp_kernel(%arg0: i32, %arg1: memref<2x256xbf16, #tpu.memory_space<vmem>>, %arg2: memref<256x120xbf16, #tpu.memory_space<vmem>>, %arg3: memref<1x120xf32, #tpu.memory_space<vmem>>, %arg4: memref<120x84xbf16, #tpu.memory_space<vmem>>, %arg5: memref<1x84xf32, #tpu.memory_space<vmem>>, %arg6: memref<84x128xbf16, #tpu.memory_space<vmem>>, %arg7: memref<1x128xf32, #tpu.memory_space<vmem>>, %arg8: memref<2x128xf32, #tpu.memory_space<vmem>>) attributes {dimension_semantics = [#tpu.dimension_semantics<parallel>], iteration_bounds = array<i64: 1>, scalar_prefetch = 0 : i64, scratch_operands = 0 : i64, tpu.core_type = #tpu.core_type<tc>, window_params = [{transform_indices = @transform_0, window_bounds = array<i64: 2, 256>}, {pipeline_mode = #tpu.pipeline_mode<synchronous>, transform_indices = @transform_1, window_bounds = array<i64: 256, 120>}, {pipeline_mode = #tpu.pipeline_mode<synchronous>, transform_indices = @transform_2, window_bounds = array<i64: 1, 120>}, {pipeline_mode = #tpu.pipeline_mode<synchronous>, transform_indices = @transform_3, window_bounds = array<i64: 120, 84>}, {pipeline_mode = #tpu.pipeline_mode<synchronous>, transform_indices = @transform_4, window_bounds = array<i64: 1, 84>}, {pipeline_mode = #tpu.pipeline_mode<synchronous>, transform_indices = @transform_5, window_bounds = array<i64: 84, 128>}, {pipeline_mode = #tpu.pipeline_mode<synchronous>, transform_indices = @transform_6, window_bounds = array<i64: 1, 128>}, {transform_indices = @transform_7, window_bounds = array<i64: 2, 128>}]} {
    %c0 = arith.constant 0 : index
    %c0_0 = arith.constant 0 : index
    %0 = vector.load %arg1[%c0, %c0_0] : memref<2x256xbf16, #tpu.memory_space<vmem>>, vector<2x256xbf16>
    %c0_1 = arith.constant 0 : index
    %c0_2 = arith.constant 0 : index
    %1 = vector.load %arg2[%c0_1, %c0_2] : memref<256x120xbf16, #tpu.memory_space<vmem>>, vector<256x120xbf16>
    %cst = arith.constant dense<0.000000e+00> : vector<2x120xf32>
    %2 = tpu.matmul %0, %1, %cst {dimension_numbers = #tpu.dot_dimension_numbers<[1], [0], [0], [1], [0, 0, 1, 1], [], []>} : vector<2x256xbf16>, vector<256x120xbf16>, vector<2x120xf32> -> vector<2x120xf32>
    %c0_3 = arith.constant 0 : index
    %c0_4 = arith.constant 0 : index
    %3 = vector.load %arg3[%c0_3, %c0_4] : memref<1x120xf32, #tpu.memory_space<vmem>>, vector<1x120xf32>
    %4 = vector.broadcast %3 : vector<1x120xf32> to vector<2x120xf32>
    %5 = arith.addf %2, %4 : vector<2x120xf32>
    %cst_5 = arith.constant 0.000000e+00 : f32
    %6 = vector.broadcast %cst_5 : f32 to vector<2x120xf32>
    %7 = arith.maximumf %5, %6 : vector<2x120xf32>
    %8 = arith.truncf %7 : vector<2x120xf32> to vector<2x120xbf16>
    %c0_6 = arith.constant 0 : index
    %c0_7 = arith.constant 0 : index
    %9 = vector.load %arg4[%c0_6, %c0_7] : memref<120x84xbf16, #tpu.memory_space<vmem>>, vector<120x84xbf16>
    %cst_8 = arith.constant dense<0.000000e+00> : vector<2x84xf32>
    %10 = tpu.matmul %8, %9, %cst_8 {dimension_numbers = #tpu.dot_dimension_numbers<[1], [0], [0], [1], [0, 0, 1, 1], [], []>} : vector<2x120xbf16>, vector<120x84xbf16>, vector<2x84xf32> -> vector<2x84xf32>
    %c0_9 = arith.constant 0 : index
    %c0_10 = arith.constant 0 : index
    %11 = vector.load %arg5[%c0_9, %c0_10] : memref<1x84xf32, #tpu.memory_space<vmem>>, vector<1x84xf32>
    %12 = vector.broadcast %11 : vector<1x84xf32> to vector<2x84xf32>
    %13 = arith.addf %10, %12 : vector<2x84xf32>
    %cst_11 = arith.constant 0.000000e+00 : f32
    %14 = vector.broadcast %cst_11 : f32 to vector<2x84xf32>
    %15 = arith.maximumf %13, %14 : vector<2x84xf32>
    %16 = arith.truncf %15 : vector<2x84xf32> to vector<2x84xbf16>
    %c0_12 = arith.constant 0 : index
    %c0_13 = arith.constant 0 : index
    %17 = vector.load %arg6[%c0_12, %c0_13] : memref<84x128xbf16, #tpu.memory_space<vmem>>, vector<84x128xbf16>
    %cst_14 = arith.constant dense<0.000000e+00> : vector<2x128xf32>
    %18 = tpu.matmul %16, %17, %cst_14 {dimension_numbers = #tpu.dot_dimension_numbers<[1], [0], [0], [1], [0, 0, 1, 1], [], []>} : vector<2x84xbf16>, vector<84x128xbf16>, vector<2x128xf32> -> vector<2x128xf32>
    %c0_15 = arith.constant 0 : index
    %c0_16 = arith.constant 0 : index
    %19 = vector.load %arg7[%c0_15, %c0_16] : memref<1x128xf32, #tpu.memory_space<vmem>>, vector<1x128xf32>
    %20 = vector.broadcast %19 : vector<1x128xf32> to vector<2x128xf32>
    %21 = arith.addf %18, %20 : vector<2x128xf32>
    %c0_17 = arith.constant 0 : index
    %c0_18 = arith.constant 0 : index
    %22 = vector.load %arg8[%c0_17, %c0_18] : memref<2x128xf32, #tpu.memory_space<vmem>>, vector<2x128xf32>
    tpu.vector_store %arg8[%c0_17, %c0_18], %21 {strides = array<i32>} : memref<2x128xf32, #tpu.memory_space<vmem>>, vector<2x128xf32>,
    return
  }
  func.func @transform_0(%arg0: i32) -> (i32, i32) {
    %c0_i32 = arith.constant 0 : i32
    %c0_i32_0 = arith.constant 0 : i32
    return %arg0, %c0_i32 : i32, i32
  }
  func.func @transform_1(%arg0: i32) -> (i32, i32) {
    %c0_i32 = arith.constant 0 : i32
    %c0_i32_0 = arith.constant 0 : i32
    %c0_i32_1 = arith.constant 0 : i32
    return %c0_i32, %c0_i32_0 : i32, i32
  }
  func.func @transform_2(%arg0: i32) -> (i32, i32) {
    %c0_i32 = arith.constant 0 : i32
    %c0_i32_0 = arith.constant 0 : i32
    %c0_i32_1 = arith.constant 0 : i32
    return %c0_i32, %c0_i32_0 : i32, i32
  }
  func.func @transform_3(%arg0: i32) -> (i32, i32) {
    %c0_i32 = arith.constant 0 : i32
    %c0_i32_0 = arith.constant 0 : i32
    %c0_i32_1 = arith.constant 0 : i32
    return %c0_i32, %c0_i32_0 : i32, i32
  }
  func.func @transform_4(%arg0: i32) -> (i32, i32) {
    %c0_i32 = arith.constant 0 : i32
    %c0_i32_0 = arith.constant 0 : i32
    %c0_i32_1 = arith.constant 0 : i32
    return %c0_i32, %c0_i32_0 : i32, i32
  }
  func.func @transform_5(%arg0: i32) -> (i32, i32) {
    %c0_i32 = arith.constant 0 : i32
    %c0_i32_0 = arith.constant 0 : i32
    %c0_i32_1 = arith.constant 0 : i32
    return %c0_i32, %c0_i32_0 : i32, i32
  }
  func.func @transform_6(%arg0: i32) -> (i32, i32) {
    %c0_i32 = arith.constant 0 : i32
    %c0_i32_0 = arith.constant 0 : i32
    %c0_i32_1 = arith.constant 0 : i32
    return %c0_i32, %c0_i32_0 : i32, i32
  }
  func.func @transform_7(%arg0: i32) -> (i32, i32) {
    %c0_i32 = arith.constant 0 : i32
    %c0_i32_0 = arith.constant 0 : i32
    return %arg0, %c0_i32 : i32, i32
  }
}

</mosaic_0001>

<bundles_post_ra>
// kernel: lenet_forward.3
= control target key start
LH: loop header
LB: loop body
LE: loop exit
PB: predicated region body
PF: predicated region fallthrough
CT: control target
= control target key end

     0   :  { %vm758_vm0 = vcmask 1043456   ;;  %vm759_vm1 = vcmask 1044480   ;;  %vm541_vm2 = vcmask 203776   ;;  %v2116_v1 = vmov 65535   ;;  %s3181_s1 = inlined_call_operand.vmem [shape: bf16[25,6], index: 1, kind: input, shape index: {}]   ;;  %s3182_s0 = inlined_call_operand.vmem [shape: bf16[2,4,144,25], index: 0, kind: input, shape index: {}]   ;;  %s3183_s2 = inlined_call_operand.vmem [shape: f32[1,6], index: 2, kind: input, shape index: {}]   ;;  %s3184_s3 = inlined_call_operand.vmem [shape: f32[2,144,6], index: 3, kind: output, shape index: {}]  }
   0x1   :  { %v2041_v0 = vld [vmem:[%s3181_s1] sm:$0xff]   ;;  %v760_v2 = vsel %vm758_vm0, 4294967295, %v2116_v1  ;;  %v2042_v3 = vld [vmem:[%s3181_s1 + $0x8] sm:$0x1f]   ;;  %v2047_v10 = vld [vmem:[%s3182_s0 + $0x10] sm:$0xff]   ;;  %vm1626_vm3 = vcmask 48128  }
   0x2   :  { %1888 = vmatprep.subr.bf16.mxu0 %v2041_v0  ;;  %2036 = vmatprep.subr.bf16.mxu1 %v2041_v0  ;;  %v761_v4 = vsel %vm759_vm1, %v760_v2, 0  ;;  %v2043_v5 = vld [vmem:[%s3182_s0] sm:$0xff]   ;;  %v2045_v8 = vld [vmem:[%s3182_s0 + $0x8] sm:$0xff]   ;;  %v2048_v11 = vld [vmem:[%s3182_s0 + $0x130] sm:$0xff]  }
   0x3   :  { %1889 = vmatpush3.bf16.msra.mxu0 %v2041_v0  ;;  %2038 = vmatpush3.bf16.msra.mxu1 %v2041_v0  ;;  %v763_v6 = vand.u32 %v2042_v3, %v761_v4  ;;  %v2044_v7 = vld [vmem:[%s3182_s0 + $0x120] sm:$0xff]   ;;  %v2046_v9 = vld [vmem:[%s3182_s0 + $0x128] sm:$0xff]   ;;  %v2049_v12 = vld [vmem:[%s3182_s0 + $0x18] sm:$0xff]  }
   0x4   :  { %1892 = vmatprep.mubr.msk.bf16.mxu0 %vm541_vm2, %v2043_v5  ;;  %1964 = vmatprep.mubr.msk.bf16.mxu1 %vm541_vm2, %v2044_v7  ;;  %v2050_v13 = vld [vmem:[%s3182_s0 + $0x138] sm:$0xff]   ;;  %v2051_v14 = vld [vmem:[%s3182_s0 + $0x20] sm:$0xff]   ;;  %v2053_v16 = vld [vmem:[%s3182_s0 + $0x28] sm:$0xff]  }
   0x5   :  { %1890 = vmatprep.subr.bf16.mxu0 %v763_v6  ;;  %2037 = vmatprep.subr.bf16.mxu1 %v763_v6  ;;  %v2052_v15 = vld [vmem:[%s3182_s0 + $0x140] sm:$0xff]   ;;  %v2054_v17 = vld [vmem:[%s3182_s0 + $0x148] sm:$0xff]   ;;  %v2055_v18 = vld [vmem:[%s3182_s0 + $0x30] sm:$0xff]  }
   0x6   :  { %v2056_v19 = vld [vmem:[%s3182_s0 + $0x150] sm:$0xff]   ;;  %v2057_v20 = vld [vmem:[%s3182_s0 + $0x38] sm:$0xff]   ;;  %v2059_v22 = vld [vmem:[%s3182_s0 + $0x40] sm:$0xff]  }
   0x7   :  { %1891 = vmatpush3.bf16.msra.mxu0 %v763_v6  ;;  %2039 = vmatpush3.bf16.msra.mxu1 %v763_v6  ;;  %v2058_v21 = vld [vmem:[%s3182_s0 + $0x158] sm:$0xff]   ;;  %v2060_v23 = vld [vmem:[%s3182_s0 + $0x160] sm:$0xff]   ;;  %v2061_v24 = vld [vmem:[%s3182_s0 + $0x48] sm:$0xff]  }
   0x8   :  { %v2062_v25 = vld [vmem:[%s3182_s0 + $0x168] sm:$0xff]   ;;  %v2063_v26 = vld [vmem:[%s3182_s0 + $0x50] sm:$0xff]   ;;  %v2065_v28 = vld [vmem:[%s3182_s0 + $0x58] sm:$0xff]  }
   0x9   :  { %v2064_v27 = vld [vmem:[%s3182_s0 + $0x170] sm:$0xff]   ;;  %v2066_v29 = vld [vmem:[%s3182_s0 + $0x178] sm:$0xff]   ;;  %v2067_v30 = vld [vmem:[%s3182_s0 + $0x60] sm:$0xff]  }
   0xa   :  { %1893 = vmatmul.mubr.msk.bf16.vlgmr.msra.gmra.mrb[0].mxu0 %vm541_vm2, %v2045_v8  ;;  %1965 = vmatmul.mubr.msk.bf16.vlgmr.msra.gmra.mrb[0].mxu1 %vm541_vm2, %v2046_v9  ;;  %v2068_v31 = vld [vmem:[%s3182_s0 + $0x180] sm:$0xff]   ;;  %v2069_v32 = vld [vmem:[%s3182_s0 + $0x68] sm:$0xff]   ;;  %v2071_v34 = vld [vmem:[%s3182_s0 + $0x70] sm:$0xff]  }
   0xb   :  { %1896 = vmatprep.mubr.msk.bf16.mxu0 %vm541_vm2, %v2047_v10  ;;  %1968 = vmatprep.mubr.msk.bf16.mxu1 %vm541_vm2, %v2048_v11  ;;  %v2070_v33 = vld [vmem:[%s3182_s0 + $0x188] sm:$0xff]   ;;  %v2072_v35 = vld [vmem:[%s3182_s0 + $0x190] sm:$0xff]   ;;  %v2073_v36 = vld [vmem:[%s3182_s0 + $0x78] sm:$0xff]  }
   0xc   :  { %v2074_v37 = vld [vmem:[%s3182_s0 + $0x198] sm:$0xff]   ;;  %v2075_v38 = vld [vmem:[%s3182_s0 + $0x80] sm:$0xff]   ;;  %v2077_v40 = vld [vmem:[%s3182_s0 + $0x88] sm:$0xff]  }
   0xd   :  { %v2076_v39 = vld [vmem:[%s3182_s0 + $0x1a0] sm:$0xff]   ;;  %v2078_v41 = vld [vmem:[%s3182_s0 + $0x1a8] sm:$0xff]   ;;  %v2079_v42 = vld [vmem:[%s3182_s0 + $0x90] sm:$0xff]  }
   0xe   :  { %v2080_v43 = vld [vmem:[%s3182_s0 + $0x1b0] sm:$0xff]   ;;  %v2081_v44 = vld [vmem:[%s3182_s0 + $0x98] sm:$0xff]   ;;  %v2083_v46 = vld [vmem:[%s3182_s0 + $0xa0] sm:$0xff]  }
   0xf   :  { %v2082_v45 = vld [vmem:[%s3182_s0 + $0x1b8] sm:$0xff]   ;;  %v2084_v47 = vld [vmem:[%s3182_s0 + $0x1c0] sm:$0xff]   ;;  %v2085_v48 = vld [vmem:[%s3182_s0 + $0xa8] sm:$0xff]  }
  0x10   :  { %v2086_v49 = vld [vmem:[%s3182_s0 + $0x1c8] sm:$0xff]   ;;  %v2087_v50 = vld [vmem:[%s3182_s0 + $0xb0] sm:$0xff]   ;;  %v2089_v52 = vld [vmem:[%s3182_s0 + $0xb8] sm:$0xff]  }
  0x11   :  { %v2088_v51 = vld [vmem:[%s3182_s0 + $0x1d0] sm:$0xff]   ;;  %v2090_v53 = vld [vmem:[%s3182_s0 + $0x1d8] sm:$0xff]   ;;  %v2091_v54 = vld [vmem:[%s3182_s0 + $0xc0] sm:$0xff]  }
  0x12   :  { %1897 = vmatmul.mubr.msk.bf16.gmra.mrb[4].mxu0 %vm541_vm2, %v2049_v12  ;;  %1969 = vmatmul.mubr.msk.bf16.gmra.mrb[4].mxu1 %vm541_vm2, %v2050_v13  ;;  %v2092_v55 = vld [vmem:[%s3182_s0 + $0x1e0] sm:$0xff]   ;;  %v2093_v56 = vld [vmem:[%s3182_s0 + $0xc8] sm:$0xff]   ;;  %v2095_v58 = vld [vmem:[%s3182_s0 + $0xd0] sm:$0xff]  }
  0x13   :  { %1900 = vmatprep.mubr.msk.bf16.mxu0 %vm541_vm2, %v2051_v14  ;;  %1972 = vmatprep.mubr.msk.bf16.mxu1 %vm541_vm2, %v2052_v15  ;;  %v2094_v57 = vld [vmem:[%s3182_s0 + $0x1e8] sm:$0xff]   ;;  %v2096_v59 = vld [vmem:[%s3182_s0 + $0x1f0] sm:$0xff]   ;;  %v2097_v60 = vld [vmem:[%s3182_s0 + $0xd8] sm:$0xff]  }
  0x14   :  { %v2098_v61 = vld [vmem:[%s3182_s0 + $0x1f8] sm:$0xff]   ;;  %v2099_v62 = vld [vmem:[%s3182_s0 + $0xe0] sm:$0xff]   ;;  %v2101_v0 = vld [vmem:[%s3182_s0 + $0xe8] sm:$0xff]  }
  0x15   :  { %v2100_v63 = vld [vmem:[%s3182_s0 + $0x200] sm:$0xff]   ;;  %v2102_v1 = vld [vmem:[%s3182_s0 + $0x208] sm:$0xff]   ;;  %v2103_v2 = vld [vmem:[%s3182_s0 + $0xf0] sm:$0xff]  }
  0x16   :  { %v2104_v3 = vld [vmem:[%s3182_s0 + $0x210] sm:$0xff]   ;;  %v2105_v4 = vld [vmem:[%s3182_s0 + $0xf8] sm:$0xff]   ;;  %v2107_v6 = vld [vmem:[%s3182_s0 + $0x100] sm:$0xff]  }
  0x17   :  { %v2106_v5 = vld [vmem:[%s3182_s0 + $0x218] sm:$0xff]   ;;  %v2108_v7 = vld [vmem:[%s3182_s0 + $0x220] sm:$0xff]   ;;  %v2109_v8 = vld [vmem:[%s3182_s0 + $0x108] sm:$0xff]  }
  0x18   :  { %v2110_v9 = vld [vmem:[%s3182_s0 + $0x228] sm:$0xff]   ;;  %v2111_v10 = vld [vmem:[%s3182_s0 + $0x110] sm:$0xff]   ;;  %v2113_v12 = vld [vmem:[%s3182_s0 + $0x118] sm:$0xff]  }
  0x19   :  { %v2112_v11 = vld [vmem:[%s3182_s0 + $0x230] sm:$0xff]   ;;  %v2114_v13 = vld [vmem:[%s3182_s0 + $0x238] sm:$0xff]  }
  0x1a   :  { %1901 = vmatmul.mubr.msk.bf16.gmra.mrb[8].mxu0 %vm541_vm2, %v2053_v16  ;;  %1973 = vmatmul.mubr.msk.bf16.gmra.mrb[8].mxu1 %vm541_vm2, %v2054_v17 }
  0x1b   :  { %1904 = vmatprep.mubr.msk.bf16.mxu0 %vm541_vm2, %v2055_v18  ;;  %1976 = vmatprep.mubr.msk.bf16.mxu1 %vm541_vm2, %v2056_v19 }
  0x22   :  { %1905 = vmatmul.mubr.msk.bf16.gmra.mrb[12].mxu0 %vm541_vm2, %v2057_v20  ;;  %1977 = vmatmul.mubr.msk.bf16.gmra.mrb[12].mxu1 %vm541_vm2, %v2058_v21 }
  0x23   :  { %1908 = vmatprep.mubr.msk.bf16.mxu0 %vm541_vm2, %v2059_v22  ;;  %1980 = vmatprep.mubr.msk.bf16.mxu1 %vm541_vm2, %v2060_v23 }
  0x2a   :  { %1909 = vmatmul.mubr.msk.bf16.gmra.mrb[16].mxu0 %vm541_vm2, %v2061_v24  ;;  %1981 = vmatmul.mubr.msk.bf16.gmra.mrb[16].mxu1 %vm541_vm2, %v2062_v25 }
  0x2b   :  { %1912 = vmatprep.mubr.msk.bf16.mxu0 %vm541_vm2, %v2063_v26  ;;  %1984 = vmatprep.mubr.msk.bf16.mxu1 %vm541_vm2, %v2064_v27 }
  0x32   :  { %1913 = vmatmul.mubr.msk.bf16.gmra.mrb[20].mxu0 %vm541_vm2, %v2065_v28  ;;  %1985 = vmatmul.mubr.msk.bf16.gmra.mrb[20].mxu1 %vm541_vm2, %v2066_v29 }
  0x33   :  { %1916 = vmatprep.mubr.msk.bf16.mxu0 %vm541_vm2, %v2067_v30  ;;  %1988 = vmatprep.mubr.msk.bf16.mxu1 %vm541_vm2, %v2068_v31 }
  0x3a   :  { %1917 = vmatmul.mubr.msk.bf16.gmra.mrb[24].mxu0 %vm541_vm2, %v2069_v32  ;;  %1989 = vmatmul.mubr.msk.bf16.gmra.mrb[24].mxu1 %vm541_vm2, %v2070_v33 }
  0x3b   :  { %1920 = vmatprep.mubr.msk.bf16.mxu0 %vm541_vm2, %v2071_v34  ;;  %1992 = vmatprep.mubr.msk.bf16.mxu1 %vm541_vm2, %v2072_v35 }
  0x42   :  { %1921 = vmatmul.mubr.msk.bf16.gmra.mrb[28].mxu0 %vm541_vm2, %v2073_v36  ;;  %1993 = vmatmul.mubr.msk.bf16.gmra.mrb[28].mxu1 %vm541_vm2, %v2074_v37 }
  0x43   :  { %1924 = vmatprep.mubr.msk.bf16.mxu0 %vm541_vm2, %v2075_v38  ;;  %1996 = vmatprep.mubr.msk.bf16.mxu1 %vm541_vm2, %v2076_v39  ;;  %v2438_v38 = vld [vmem:[%s3183_s2] ss:$0 sm:$0xff] }
  0x4a   :  { %1925 = vmatmul.mubr.msk.bf16.gmra.mrb[32].mxu0 %vm541_vm2, %v2077_v40  ;;  %1997 = vmatmul.mubr.msk.bf16.gmra.mrb[32].mxu1 %vm541_vm2, %v2078_v41 }
  0x4b   :  { %1928 = vmatprep.mubr.msk.bf16.mxu0 %vm541_vm2, %v2079_v42  ;;  %2000 = vmatprep.mubr.msk.bf16.mxu1 %vm541_vm2, %v2080_v43 }
  0x52   :  { %1929 = vmatmul.mubr.msk.bf16.gmra.mrb[36].mxu0 %vm541_vm2, %v2081_v44  ;;  %2001 = vmatmul.mubr.msk.bf16.gmra.mrb[36].mxu1 %vm541_vm2, %v2082_v45 }
  0x53   :  { %1932 = vmatprep.mubr.msk.bf16.mxu0 %vm541_vm2, %v2083_v46  ;;  %2004 = vmatprep.mubr.msk.bf16.mxu1 %vm541_vm2, %v2084_v47 }
  0x5a   :  { %1933 = vmatmul.mubr.msk.bf16.gmra.mrb[40].mxu0 %vm541_vm2, %v2085_v48  ;;  %2005 = vmatmul.mubr.msk.bf16.gmra.mrb[40].mxu1 %vm541_vm2, %v2086_v49 }
  0x5b   :  { %1936 = vmatprep.mubr.msk.bf16.mxu0 %vm541_vm2, %v2087_v50  ;;  %2008 = vmatprep.mubr.msk.bf16.mxu1 %vm541_vm2, %v2088_v51 }
  0x62   :  { %1937 = vmatmul.mubr.msk.bf16.gmra.mrb[44].mxu0 %vm541_vm2, %v2089_v52  ;;  %2009 = vmatmul.mubr.msk.bf16.gmra.mrb[44].mxu1 %vm541_vm2, %v2090_v53 }
  0x63   :  { %1940 = vmatprep.mubr.msk.bf16.mxu0 %vm541_vm2, %v2091_v54  ;;  %2012 = vmatprep.mubr.msk.bf16.mxu1 %vm541_vm2, %v2092_v55 }
  0x6a   :  { %1941 = vmatmul.mubr.msk.bf16.gmra.mrb[48].mxu0 %vm541_vm2, %v2093_v56  ;;  %2013 = vmatmul.mubr.msk.bf16.gmra.mrb[48].mxu1 %vm541_vm2, %v2094_v57 }
  0x6b   :  { %1944 = vmatprep.mubr.msk.bf16.mxu0 %vm541_vm2, %v2095_v58  ;;  %2016 = vmatprep.mubr.msk.bf16.mxu1 %vm541_vm2, %v2096_v59 }
  0x72   :  { %1945 = vmatmul.mubr.msk.bf16.gmra.mrb[52].mxu0 %vm541_vm2, %v2097_v60  ;;  %2017 = vmatmul.mubr.msk.bf16.gmra.mrb[52].mxu1 %vm541_vm2, %v2098_v61 }
  0x73   :  { %1948 = vmatprep.mubr.msk.bf16.mxu0 %vm541_vm2, %v2099_v62  ;;  %2020 = vmatprep.mubr.msk.bf16.mxu1 %vm541_vm2, %v2100_v63 }
  0x7a   :  { %1949 = vmatmul.mubr.msk.bf16.gmra.mrb[56].mxu0 %vm541_vm2, %v2101_v0  ;;  %2021 = vmatmul.mubr.msk.bf16.gmra.mrb[56].mxu1 %vm541_vm2, %v2102_v1 }
  0x7b   :  { %1952 = vmatprep.mubr.msk.bf16.mxu0 %vm541_vm2, %v2103_v2  ;;  %2024 = vmatprep.mubr.msk.bf16.mxu1 %vm541_vm2, %v2104_v3 }
  0x82   :  { %1953 = vmatmul.mubr.msk.bf16.gmra.mrb[60].mxu0 %vm541_vm2, %v2105_v4  ;;  %2025 = vmatmul.mubr.msk.bf16.gmra.mrb[60].mxu1 %vm541_vm2, %v2106_v5 }
  0x83   :  { %1956 = vmatprep.mubr.msk.bf16.mxu0 %vm541_vm2, %v2107_v6  ;;  %2028 = vmatprep.mubr.msk.bf16.mxu1 %vm541_vm2, %v2108_v7 }
  0x8a   :  { %1957 = vmatmul.mubr.msk.bf16.gmra.mrb[64].mxu0 %vm541_vm2, %v2109_v8  ;;  %2029 = vmatmul.mubr.msk.bf16.gmra.mrb[64].mxu1 %vm541_vm2, %v2110_v9 }
  0x8b   :  { %1960 = vmatprep.mubr.msk.bf16.mxu0 %vm541_vm2, %v2111_v10  ;;  %2032 = vmatprep.mubr.msk.bf16.mxu1 %vm541_vm2, %v2112_v11 }
  0x92   :  { %1961 = vmatmul.mubr.msk.bf16.gmra.mrb[68].mxu0 %vm541_vm2, %v2113_v12  ;;  %2033 = vmatmul.mubr.msk.bf16.gmra.mrb[68].mxu1 %vm541_vm2, %v2114_v13 }
  0xdd   :  { %v1894_v14 = vpop.f32.mrb[0].mxu0  ;;  %v1966_v15 = vpop.f32.mrb[0].mxu1 }
  0xde   :  { %v799_v16 = vpop.f32.mrb[1].mxu0  ;;  %v1087_v17 = vpop.f32.mrb[1].mxu1  ;;  %v2449_v43 = vadd.f32 %v1894_v14, %v2438_v38  ;;  %v2452_v44 = vadd.f32 %v1966_v15, %v2438_v38 }
  0xdf   :  { %v1895_v18 = vpop.f32.mrb[2].mxu0  ;;  %v1967_v19 = vpop.f32.mrb[2].mxu1  ;;  %v800_v45 = vadd.f32 %v2438_v38, %v799_v16  ;;  %v1088_v46 = vadd.f32 %v2438_v38, %v1087_v17 }
  0xe0   :  { %v802_v20 = vpop.f32.mrb[3].mxu0  ;;  %v1090_v21 = vpop.f32.mrb[3].mxu1  ;;  %v2461_v49 = vadd.f32 %v1895_v18, %v2438_v38  ;;  %v2464_v50 = vadd.f32 %v1967_v19, %v2438_v38  ;;  %v1376_v59 = vmax.f32 %v2449_v43, 0.0  ;;  %v1448_v60 = vmax.f32 %v2452_v44, 0.0 }
  0xe1   :  { %v803_v51 = vadd.f32 %v2438_v38, %v802_v20  ;;  %v1091_v52 = vadd.f32 %v2438_v38, %v1090_v21  ;;  %v1374_v61 = vmax.f32 %v800_v45, 0.0  ;;  %v1446_v62 = vmax.f32 %v1088_v46, 0.0 }
  0xe2   :  { %v1377_v63 = vmax.f32 %v2461_v49, 0.0  ;;  %v1449_v0 = vmax.f32 %v2464_v50, 0.0 }
  0xe3   :  { %v1375_v1 = vmax.f32 %v803_v51, 0.0  ;;  %v1447_v2 = vmax.f32 %v1091_v52, 0.0 }
  0xe5   :  { %v1898_v22 = vpop.f32.mrb[4].mxu0  ;;  %v1970_v23 = vpop.f32.mrb[4].mxu1 }
  0xe6   :  { %v815_v24 = vpop.f32.mrb[5].mxu0  ;;  %v1103_v25 = vpop.f32.mrb[5].mxu1  ;;  %v2473_v55 = vadd.f32 %v1898_v22, %v2438_v38  ;;  %v2476_v56 = vadd.f32 %v1970_v23, %v2438_v38 }
  0xe7   :  { %v1899_v26 = vpop.f32.mrb[6].mxu0  ;;  %v1971_v27 = vpop.f32.mrb[6].mxu1  ;;  %v2479_v57 = vadd.f32 %v2438_v38, %v815_v24  ;;  %v2482_v58 = vadd.f32 %v2438_v38, %v1103_v25 }
  0xe8   :  { %v818_v28 = vpop.f32.mrb[7].mxu0  ;;  %v1106_v29 = vpop.f32.mrb[7].mxu1  ;;  %v1380_v3 = vmax.f32 %v2473_v55, 0.0  ;;  %v2491_v5 = vadd.f32 %v1899_v26, %v2438_v38  ;;  %v2494_v6 = vadd.f32 %v1971_v27, %v2438_v38 }
  0xe9   :  { %v1378_v9 = vmax.f32 %v2479_v57, 0.0  ;;  %v1450_v10 = vmax.f32 %v2482_v58, 0.0  ;;  %v2505_v15 = vadd.f32 %v2438_v38, %v818_v28  ;;  %v2508_v16 = vadd.f32 %v2438_v38, %v1106_v29 }
  0xeb   :  { %v1451_v57 = vmax.f32 %v2508_v16, 0.0 }
  0xed   :  { %v1902_v30 = vpop.f32.mrb[8].mxu0  ;;  %v1974_v31 = vpop.f32.mrb[8].mxu1 }
  0xee   :  { %v831_v32 = vpop.f32.mrb[9].mxu0  ;;  %v1119_v33 = vpop.f32.mrb[9].mxu1  ;;  %v2511_v17 = vadd.f32 %v1902_v30, %v2438_v38  ;;  %v2514_v18 = vadd.f32 %v1974_v31, %v2438_v38 }
  0xef   :  { %v1903_v34 = vpop.f32.mrb[10].mxu0  ;;  %v1975_v35 = vpop.f32.mrb[10].mxu1  ;;  %v2523_v27 = vadd.f32 %v2438_v38, %v831_v32  ;;  %v2526_v28 = vadd.f32 %v2438_v38, %v1119_v33 }
  0xf0   :  { %v2431_v36 = vpop.f32.mrb[11].mxu0  ;;  %v2433_v37 = vpop.f32.mrb[11].mxu1  ;;  %v2529_v29 = vadd.f32 %v1903_v34, %v2438_v38  ;;  %v2532_v30 = vadd.f32 %v1975_v35, %v2438_v38  ;;  %v1379_v35 = vmax.f32 %v2505_v15, 0.0 }
  0xf1   :  { %v2542_v33 = vadd.f32 %v2438_v38, %v2431_v36  ;;  %v2546_v34 = vadd.f32 %v2438_v38, %v2433_v37  ;;  %v1454_v36 = vmax.f32 %v2526_v28, 0.0 }
  0xf3   :  { %v3194_v28 = vmax.f32 %v2542_v33, 0.0 }
  0xf5   :  { %v2440_v39 = vpop.f32.mrb[12].mxu0  ;;  %v2442_v40 = vpop.f32.mrb[12].mxu1 }
  0xf6   :  { %v2444_v41 = vpop.f32.mrb[13].mxu0  ;;  %v2446_v42 = vpop.f32.mrb[13].mxu1 }
  0xf7   :  { %v2456_v47 = vpop.f32.mrb[14].mxu0  ;;  %v2458_v48 = vpop.f32.mrb[14].mxu1  ;;  %v2596_v43 = vadd.f32 %v2438_v38, %v2444_v41  ;;  %v2600_v44 = vadd.f32 %v2438_v38, %v2446_v42 }
  0xf8   :  { %v2468_v53 = vpop.f32.mrb[15].mxu0  ;;  %v2470_v54 = vpop.f32.mrb[15].mxu1  ;;  %v2616_v41 = vadd.f32 %v2458_v48, %v2438_v38 }
  0xf9   :  { %v2622_v50 = vadd.f32 %v2438_v38, %v2468_v53 }
  0xfb   :  { %v1387_v55 = vmax.f32 %v2622_v50, 0.0 }
  0xfd   :  { %v1910_v7 = vpop.f32.mrb[16].mxu0  ;;  %v1982_v8 = vpop.f32.mrb[16].mxu1 }
  0xfe   :  { %v872_v11 = vadd.f32 %v1910_v7, %v2438_v38  ;;  %v1160_v12 = vadd.f32 %v1982_v8, %v2438_v38  ;;  %v2500_v13 = vpop.f32.mrb[17].mxu0  ;;  %v2502_v14 = vpop.f32.mrb[17].mxu1  ;;  %v1382_v8 = vmax.f32 %v2523_v27, 0.0  ;;  %v1386_v27 = vmax.f32 %v2596_v43, 0.0 }
  0xff   :  { %v1911_v19 = vpop.f32.mrb[18].mxu0  ;;  %v1983_v20 = vpop.f32.mrb[18].mxu1  ;;  %v3197_v43 = vmax.f32 %v2494_v6, 0.0 }
 0x100   :  { %v1392_v21 = vmax.f32 %v872_v11, 0.0  ;;  %v1464_v22 = vmax.f32 %v1160_v12, 0.0  ;;  %v875_v23 = vadd.f32 %v1911_v19, %v2438_v38  ;;  %v1163_v24 = vadd.f32 %v1983_v20, %v2438_v38  ;;  %v2518_v25 = vpop.f32.mrb[19].mxu0  ;;  %v2520_v26 = vpop.f32.mrb[19].mxu1 }
 0x101   :  { %v2682_v6 = vadd.f32 %v2438_v38, %v2518_v25 }
 0x102   :  { %v2534_v31 = vmax.f32 %v1374_v61, %v1392_v21  ;;  %v2536_v45 = vmax.f32 %v1446_v62, %v1464_v22  ;;  %v1393_v46 = vmax.f32 %v875_v23, 0.0  ;;  %v1465_v51 = vmax.f32 %v1163_v24, 0.0 }
 0x104   :  { %v2550_v58 = vmax.f32 %v1375_v1, %v1393_v46  ;;  %v2552_v61 = vmax.f32 %v1447_v2, %v1465_v51 }
 0x105   :  { %v1914_v11 = vpop.f32.mrb[20].mxu0  ;;  %v1986_v12 = vpop.f32.mrb[20].mxu1 }
 0x106   :  { %v888_v16 = vadd.f32 %v1914_v11, %v2438_v38  ;;  %v1176_v1 = vadd.f32 %v1986_v12, %v2438_v38  ;;  %v879_v2 = vpop.f32.mrb[21].mxu0  ;;  %v1167_v19 = vpop.f32.mrb[21].mxu1 }
 0x107   :  { %v880_v22 = vadd.f32 %v2438_v38, %v879_v2  ;;  %v1168_v23 = vadd.f32 %v2438_v38, %v1167_v19  ;;  %v1915_v24 = vpop.f32.mrb[22].mxu0  ;;  %v1987_v46 = vpop.f32.mrb[22].mxu1 }
 0x108   :  { %v1396_v51 = vmax.f32 %v888_v16, 0.0  ;;  %v1468_v37 = vmax.f32 %v1176_v1, 0.0  ;;  %v891_v15 = vadd.f32 %v1915_v24, %v2438_v38  ;;  %v1179_v11 = vadd.f32 %v1987_v46, %v2438_v38  ;;  %v882_v7 = vpop.f32.mrb[23].mxu0  ;;  %v1170_v12 = vpop.f32.mrb[23].mxu1 }
 0x109   :  { %v1394_v62 = vmax.f32 %v880_v22, 0.0  ;;  %v1466_v32 = vmax.f32 %v1168_v23, 0.0  ;;  %v883_v52 = vadd.f32 %v2438_v38, %v882_v7  ;;  %v1171_v21 = vadd.f32 %v2438_v38, %v1170_v12 }
 0x10a   :  { %v2570_v20 = vmax.f32 %v1378_v9, %v1396_v51  ;;  %v2572_v2 = vmax.f32 %v1450_v10, %v1468_v37  ;;  %v1397_v19 = vmax.f32 %v891_v15, 0.0  ;;  %v1469_v4 = vmax.f32 %v1179_v11, 0.0 }
 0x10b   :  { %v2576_v16 = vmax.f32 %v1376_v59, %v1394_v62  ;;  %v2580_v1 = vmax.f32 %v1448_v60, %v1466_v32  ;;  %v1395_v22 = vmax.f32 %v883_v52, 0.0  ;;  %v1467_v23 = vmax.f32 %v1171_v21, 0.0 }
 0x10c   :  { %v2584_v7 = vadd.f32 %v2440_v39, %v2438_v38  ;;  %v2588_v9 = vadd.f32 %v2442_v40, %v2438_v38  ;;  %v2590_v10 = vmax.f32 %v1379_v35, %v1397_v19  ;;  %v2592_v37 = vmax.f32 %v1451_v57, %v1469_v4 }
 0x10d   :  { %v2604_v39 = vmax.f32 %v1377_v63, %v1395_v22  ;;  %v2608_v40 = vmax.f32 %v1449_v0, %v1467_v23  ;;  %v1918_v59 = vpop.f32.mrb[24].mxu0  ;;  %v1990_v60 = vpop.f32.mrb[24].mxu1  ;;  %v2612_v4 = vadd.f32 %v2456_v47, %v2438_v38  ;;  %v2626_v0 = vadd.f32 %v2438_v38, %v2470_v54 }
 0x10e   :  { %v904_v42 = vadd.f32 %v1918_v59, %v2438_v38  ;;  %v1192_v49 = vadd.f32 %v1990_v60, %v2438_v38  ;;  %v895_v63 = vpop.f32.mrb[25].mxu0  ;;  %v1183_v52 = vpop.f32.mrb[25].mxu1  ;;  %v3193_v60 = vmax.f32 %v2476_v56, 0.0 }
 0x10f   :  { %v896_v47 = vadd.f32 %v2438_v38, %v895_v63  ;;  %v1184_v32 = vadd.f32 %v2438_v38, %v1183_v52  ;;  %v1919_v48 = vpop.f32.mrb[26].mxu0  ;;  %v1991_v35 = vpop.f32.mrb[26].mxu1  ;;  %v3195_v52 = vmax.f32 %v2546_v34, 0.0  ;;  %v1459_v56 = vmax.f32 %v2626_v0, 0.0 }
 0x110   :  { %v1400_v57 = vmax.f32 %v904_v42, 0.0  ;;  %v1472_v62 = vmax.f32 %v1192_v49, 0.0  ;;  %v907_v15 = vadd.f32 %v1919_v48, %v2438_v38  ;;  %v1195_v21 = vadd.f32 %v1991_v35, %v2438_v38  ;;  %v898_v24 = vpop.f32.mrb[27].mxu0  ;;  %v1186_v46 = vpop.f32.mrb[27].mxu1 }
 0x111   :  { %v1398_v53 = vmax.f32 %v896_v47, 0.0  ;;  %v1470_v51 = vmax.f32 %v1184_v32, 0.0  ;;  %v899_v11 = vadd.f32 %v2438_v38, %v898_v24  ;;  %v1187_v54 = vadd.f32 %v2438_v38, %v1186_v46 }
 0x112   :  { %v2636_v12 = vmax.f32 %v1382_v8, %v1400_v57  ;;  %v2640_v19 = vmax.f32 %v1454_v36, %v1472_v62  ;;  %v1401_v22 = vmax.f32 %v907_v15, 0.0  ;;  %v1473_v23 = vmax.f32 %v1195_v21, 0.0 }
 0x113   :  { %v2644_v59 = vmax.f32 %v1380_v3, %v1398_v53  ;;  %v2648_v42 = vmax.f32 %v3193_v60, %v1470_v51  ;;  %v1399_v49 = vmax.f32 %v899_v11, 0.0  ;;  %v1471_v63 = vmax.f32 %v1187_v54, 0.0 }
 0x114   :  { %v1458_v8 = vmax.f32 %v2600_v44, 0.0  ;;  %v2654_v36 = vmax.f32 %v3194_v28, %v1401_v22  ;;  %v2658_v47 = vmax.f32 %v3195_v52, %v1473_v23  ;;  %v3196_v3 = vmax.f32 %v2491_v5, 0.0 }
 0x115   :  { %v2668_v48 = vmax.f32 %v3197_v43, %v1471_v63  ;;  %v1922_v44 = vpop.f32.mrb[28].mxu0  ;;  %v1994_v33 = vpop.f32.mrb[28].mxu1  ;;  %v2672_v35 = vadd.f32 %v2438_v38, %v2500_v13  ;;  %v2676_v34 = vadd.f32 %v2438_v38, %v2502_v14  ;;  %v2686_v62 = vadd.f32 %v2438_v38, %v2520_v26 }
 0x116   :  { %v2664_v32 = vmax.f32 %v3196_v3, %v1399_v49  ;;  %v920_v50 = vadd.f32 %v1922_v44, %v2438_v38  ;;  %v1208_v5 = vadd.f32 %v1994_v33, %v2438_v38  ;;  %v911_v0 = vpop.f32.mrb[29].mxu0  ;;  %v1199_v57 = vpop.f32.mrb[29].mxu1  ;;  %v3200_v52 = vmax.f32 %v2511_v17, 0.0 }
 0x117   :  { %v912_v13 = vadd.f32 %v2438_v38, %v911_v0  ;;  %v1200_v15 = vadd.f32 %v2438_v38, %v1199_v57  ;;  %v1923_v14 = vpop.f32.mrb[30].mxu0  ;;  %v1995_v21 = vpop.f32.mrb[30].mxu1  ;;  %v3202_v43 = vmax.f32 %v2514_v18, 0.0  ;;  %v1460_v0 = vmax.f32 %v2588_v9, 0.0 }
 0x118   :  { %v1404_v24 = vmax.f32 %v920_v50, 0.0  ;;  %v1476_v46 = vmax.f32 %v1208_v5, 0.0  ;;  %v923_v53 = vadd.f32 %v1923_v14, %v2438_v38  ;;  %v1211_v51 = vadd.f32 %v1995_v21, %v2438_v38  ;;  %v914_v11 = vpop.f32.mrb[31].mxu0  ;;  %v1202_v54 = vpop.f32.mrb[31].mxu1 }
 0x119   :  { %v1402_v25 = vmax.f32 %v912_v13, 0.0  ;;  %v1474_v22 = vmax.f32 %v1200_v15, 0.0  ;;  %v915_v23 = vadd.f32 %v2438_v38, %v914_v11  ;;  %v1203_v26 = vadd.f32 %v2438_v38, %v1202_v54 }
 0x11a   :  { %v2694_v60 = vmax.f32 %v1386_v27, %v1404_v24  ;;  %v2696_v49 = vmax.f32 %v1458_v8, %v1476_v46  ;;  %v1405_v63 = vmax.f32 %v923_v53, 0.0  ;;  %v1477_v28 = vmax.f32 %v1211_v51, 0.0 }
 0x11b   :  { %v2700_v3 = vmax.f32 %v3200_v52, %v1402_v25  ;;  %v2704_v44 = vmax.f32 %v3202_v43, %v1474_v22  ;;  %v1403_v33 = vmax.f32 %v915_v23, 0.0  ;;  %v1475_v50 = vmax.f32 %v1203_v26, 0.0 }
 0x11c   :  { %3198 = vst [vmem:[#allocation2_spill] sm:$0xff] %v2694_v60  ;;  %3199 = vst [vmem:[#allocation3_spill] sm:$0xff] %v2696_v49  ;;  %v1388_v5 = vmax.f32 %v2584_v7, 0.0  ;;  %v2708_v27 = vmax.f32 %v1387_v55, %v1405_v63  ;;  %v2710_v8 = vmax.f32 %v1459_v56, %v1477_v28  ;;  %v1389_v57 = vmax.f32 %v2612_v4, 0.0 }
 0x11d   :  { %3201 = vst [vmem:[#allocation4_spill] sm:$0xff] %v2700_v3  ;;  %3203 = vst [vmem:[#allocation5_spill] sm:$0xff] %v2704_v44  ;;  %v1461_v17 = vmax.f32 %v2616_v41, 0.0  ;;  %v3206_v13 = vmax.f32 %v2529_v29, 0.0  ;;  %v3208_v18 = vmax.f32 %v2532_v30, 0.0  ;;  %v1926_v21 = vpop.f32.mrb[32].mxu0 }
 0x11e   :  { %3204 = vst [vmem:[#allocation6_spill] sm:$0xff] %v2708_v27  ;;  %3205 = vst [vmem:[#allocation7_spill] sm:$0xff] %v2710_v8  ;;  %v1998_v7 = vpop.f32.mrb[32].mxu1  ;;  %v1390_v9 = vmax.f32 %v2672_v35, 0.0  ;;  %v1462_v55 = vmax.f32 %v2676_v34, 0.0  ;;  %v936_v56 = vadd.f32 %v1926_v21, %v2438_v38  ;;  %v927_v24 = vpop.f32.mrb[33].mxu0 }
 0x11f   :  { %v2716_v15 = vmax.f32 %v3206_v13, %v1403_v33  ;;  %v2720_v14 = vmax.f32 %v3208_v18, %v1475_v50  ;;  %v1224_v4 = vadd.f32 %v1998_v7, %v2438_v38  ;;  %v1215_v41 = vpop.f32.mrb[33].mxu1  ;;  %v1391_v29 = vmax.f32 %v2682_v6, 0.0  ;;  %v1927_v51 = vpop.f32.mrb[34].mxu0 }
 0x120   :  { %v1463_v46 = vmax.f32 %v2686_v62, 0.0  ;;  %v928_v30 = vadd.f32 %v2438_v38, %v927_v24  ;;  %v1216_v53 = vadd.f32 %v2438_v38, %v1215_v41  ;;  %v1999_v11 = vpop.f32.mrb[34].mxu1  ;;  %v1408_v54 = vmax.f32 %v936_v56, 0.0  ;;  %v930_v22 = vpop.f32.mrb[35].mxu0 }
 0x121   :  { %3207 = vst [vmem:[#allocation8_spill] sm:$0xff] %v2716_v15  ;;  %3209 = vst [vmem:[#allocation9_spill] sm:$0xff] %v2720_v14  ;;  %v1480_v35 = vmax.f32 %v1224_v4, 0.0  ;;  %v939_v34 = vadd.f32 %v1927_v51, %v2438_v38  ;;  %v1227_v25 = vadd.f32 %v1999_v11, %v2438_v38  ;;  %v1218_v23 = vpop.f32.mrb[35].mxu1  ;;  %v931_v6 = vadd.f32 %v2438_v38, %v930_v22 }
 0x122   :  { %v1406_v26 = vmax.f32 %v928_v30, 0.0  ;;  %v1478_v63 = vmax.f32 %v1216_v53, 0.0  ;;  %v1219_v62 = vadd.f32 %v2438_v38, %v1218_v23  ;;  %v2734_v28 = vmax.f32 %v1390_v9, %v1408_v54 }
 0x123   :  { %v2736_v52 = vmax.f32 %v1462_v55, %v1480_v35  ;;  %v1409_v43 = vmax.f32 %v939_v34, 0.0  ;;  %v1481_v33 = vmax.f32 %v1227_v25, 0.0  ;;  %v1407_v18 = vmax.f32 %v931_v6, 0.0 }
 0x124   :  { %3210 = vst [vmem:[#allocation10_spill] sm:$0xff] %v2734_v28  ;;  %v2738_v50 = vmax.f32 %v1388_v5, %v1406_v26  ;;  %v2740_v13 = vmax.f32 %v1460_v0, %v1478_v63  ;;  %v1479_v21 = vmax.f32 %v1219_v62, 0.0 }
 0x125   :  { %3211 = vst [vmem:[#allocation11_spill] sm:$0xff] %v2736_v52  ;;  %v2742_v7 = vmax.f32 %v1391_v29, %v1409_v43  ;;  %v2744_v56 = vmax.f32 %v1463_v46, %v1481_v33  ;;  %v2746_v4 = vmax.f32 %v1389_v57, %v1407_v18  ;;  %v1930_v9 = vpop.f32.mrb[36].mxu0  ;;  %v2002_v41 = vpop.f32.mrb[36].mxu1 }
 0x126   :  { %3212 = vst [vmem:[#allocation12_spill] sm:$0xff] %v2738_v50  ;;  %3213 = vst [vmem:[#allocation13_spill] sm:$0xff] %v2740_v13  ;;  %v2748_v24 = vmax.f32 %v1461_v17, %v1479_v21  ;;  %v943_v55 = vpop.f32.mrb[37].mxu0  ;;  %v1231_v30 = vpop.f32.mrb[37].mxu1  ;;  %v2751_v62 = vadd.f32 %v1930_v9, %v2438_v38  ;;  %v2754_v43 = vadd.f32 %v2002_v41, %v2438_v38 }
 0x127   :  { %3214 = vst [vmem:[#allocation14_spill] sm:$0xff] %v2742_v7  ;;  %3215 = vst [vmem:[#allocation15_spill] sm:$0xff] %v2744_v56  ;;  %v1931_v53 = vpop.f32.mrb[38].mxu0  ;;  %v2003_v51 = vpop.f32.mrb[38].mxu1  ;;  %v2757_v33 = vadd.f32 %v2438_v38, %v943_v55  ;;  %v2760_v18 = vadd.f32 %v2438_v38, %v1231_v30 }
 0x128   :  { %3216 = vst [vmem:[#allocation16_spill] sm:$0xff] %v2746_v4  ;;  %3217 = vst [vmem:[#allocation17_spill] sm:$0xff] %v2748_v24  ;;  %v946_v5 = vpop.f32.mrb[39].mxu0  ;;  %v1234_v11 = vpop.f32.mrb[39].mxu1  ;;  %v2763_v4 = vadd.f32 %v1931_v53, %v2438_v38  ;;  %v2766_v56 = vadd.f32 %v2003_v51, %v2438_v38 }
 0x129   :  { %v2769_v9 = vadd.f32 %v2438_v38, %v946_v5  ;;  %v2772_v41 = vadd.f32 %v2438_v38, %v1234_v11 }
 0x12d   :  { %v1934_v0 = vpop.f32.mrb[40].mxu0  ;;  %v2006_v54 = vpop.f32.mrb[40].mxu1 }
 0x12e   :  { %v959_v35 = vpop.f32.mrb[41].mxu0  ;;  %v1247_v34 = vpop.f32.mrb[41].mxu1  ;;  %v2775_v55 = vadd.f32 %v1934_v0, %v2438_v38  ;;  %v2778_v30 = vadd.f32 %v2006_v54, %v2438_v38 }
 0x12f   :  { %v1935_v29 = vpop.f32.mrb[42].mxu0  ;;  %v2007_v25 = vpop.f32.mrb[42].mxu1  ;;  %v2781_v7 = vadd.f32 %v2438_v38, %v959_v35  ;;  %v2784_v53 = vadd.f32 %v2438_v38, %v1247_v34 }
 0x130   :  { %v962_v46 = vpop.f32.mrb[43].mxu0  ;;  %v1250_v22 = vpop.f32.mrb[43].mxu1  ;;  %v2797_v5 = vadd.f32 %v1935_v29, %v2438_v38  ;;  %v2800_v13 = vadd.f32 %v2007_v25, %v2438_v38 }
 0x131   :  { %v2805_v35 = vadd.f32 %v2438_v38, %v962_v46  ;;  %v2808_v14 = vadd.f32 %v2438_v38, %v1250_v22 }
 0x135   :  { %v1938_v57 = vpop.f32.mrb[44].mxu0  ;;  %v2010_v23 = vpop.f32.mrb[44].mxu1 }
 0x136   :  { %v975_v17 = vpop.f32.mrb[45].mxu0  ;;  %v1263_v26 = vpop.f32.mrb[45].mxu1  ;;  %v2811_v29 = vadd.f32 %v1938_v57, %v2438_v38  ;;  %v2814_v25 = vadd.f32 %v2010_v23, %v2438_v38 }
 0x137   :  { %v1939_v63 = vpop.f32.mrb[46].mxu0  ;;  %v2011_v6 = vpop.f32.mrb[46].mxu1  ;;  %v2817_v15 = vadd.f32 %v2438_v38, %v975_v17  ;;  %v2820_v50 = vadd.f32 %v2438_v38, %v1263_v26 }
 0x138   :  { %v978_v21 = vpop.f32.mrb[47].mxu0  ;;  %v1266_v24 = vpop.f32.mrb[47].mxu1  ;;  %3218 = vst [vmem:[#allocation18_spill] sm:$0xff] %v2811_v29  ;;  %3219 = vst [vmem:[#allocation19_spill] sm:$0xff] %v2814_v25  ;;  %v2823_v8 = vadd.f32 %v1939_v63, %v2438_v38  ;;  %v2826_v22 = vadd.f32 %v2011_v6, %v2438_v38 }
 0x139   :  { %v2829_v57 = vadd.f32 %v2438_v38, %v978_v21  ;;  %v2832_v23 = vadd.f32 %v2438_v38, %v1266_v24 }
 0x13a   :  { %3220 = vst [vmem:[#allocation20_spill] sm:$0xff] %v2823_v8  ;;  %3221 = vst [vmem:[#allocation21_spill] sm:$0xff] %v2826_v22 }
 0x13d   :  { %v1942_v52 = vpop.f32.mrb[48].mxu0  ;;  %v2014_v28 = vpop.f32.mrb[48].mxu1 }
 0x13e   :  { %v991_v11 = vpop.f32.mrb[49].mxu0  ;;  %v1279_v0 = vpop.f32.mrb[49].mxu1  ;;  %v2837_v26 = vadd.f32 %v1942_v52, %v2438_v38  ;;  %v2840_v44 = vadd.f32 %v2014_v28, %v2438_v38 }
 0x13f   :  { %v1943_v34 = vpop.f32.mrb[50].mxu0  ;;  %v2015_v51 = vpop.f32.mrb[50].mxu1  ;;  %v2845_v21 = vadd.f32 %v2438_v38, %v991_v11  ;;  %v2848_v24 = vadd.f32 %v2438_v38, %v1279_v0 }
 0x140   :  { %v994_v54 = vpop.f32.mrb[51].mxu0  ;;  %v1282_v46 = vpop.f32.mrb[51].mxu1  ;;  %3222 = vst [vmem:[#allocation22_spill] sm:$0xff] %v2837_v26  ;;  %3223 = vst [vmem:[#allocation23_spill] sm:$0xff] %v2840_v44  ;;  %v2865_v6 = vadd.f32 %v1943_v34, %v2438_v38  ;;  %v2868_v11 = vadd.f32 %v2015_v51, %v2438_v38 }
 0x141   :  { %3224 = vst [vmem:[#allocation24_spill] sm:$0xff] %v2845_v21  ;;  %3225 = vst [vmem:[#allocation25_spill] sm:$0xff] %v2848_v24  ;;  %v2873_v3 = vadd.f32 %v2438_v38, %v994_v54  ;;  %v2876_v63 = vadd.f32 %v2438_v38, %v1282_v46 }
 0x145   :  { %v1946_v49 = vpop.f32.mrb[52].mxu0  ;;  %v2018_v0 = vpop.f32.mrb[52].mxu1 }
 0x146   :  { %v1016_v27 = vadd.f32 %v1946_v49, %v2438_v38  ;;  %v1304_v52 = vadd.f32 %v2018_v0, %v2438_v38  ;;  %v1007_v25 = vpop.f32.mrb[53].mxu0  ;;  %v1295_v28 = vpop.f32.mrb[53].mxu1 }
 0x147   :  { %v1947_v22 = vpop.f32.mrb[54].mxu0  ;;  %v2019_v60 = vpop.f32.mrb[54].mxu1  ;;  %v2879_v34 = vadd.f32 %v2438_v38, %v1007_v25  ;;  %v2882_v51 = vadd.f32 %v2438_v38, %v1295_v28 }
 0x148   :  { %v1428_v26 = vmax.f32 %v1016_v27, 0.0  ;;  %v1500_v17 = vmax.f32 %v1304_v52, 0.0  ;;  %v1019_v49 = vadd.f32 %v1947_v22, %v2438_v38  ;;  %v1307_v0 = vadd.f32 %v2019_v60, %v2438_v38  ;;  %v1010_v44 = vpop.f32.mrb[55].mxu0  ;;  %v1298_v8 = vpop.f32.mrb[55].mxu1 }
 0x149   :  { %v3226_v27 = vmax.f32 %v2757_v33, 0.0  ;;  %v3227_v22 = vmax.f32 %v2760_v18, 0.0  ;;  %v2891_v46 = vadd.f32 %v2438_v38, %v1010_v44  ;;  %v2894_v25 = vadd.f32 %v2438_v38, %v1298_v8 }
 0x14a   :  { %v1429_v29 = vmax.f32 %v1019_v49, 0.0  ;;  %v1501_v24 = vmax.f32 %v1307_v0, 0.0  ;;  %v1423_v0 = vmax.f32 %v2873_v3, 0.0  ;;  %v3263_v3 = vld [vmem:[#allocation6_spill] sm:$0xff] }
 0x14b   :  { %v1554_v52 = vmax.f32 %v3226_v27, %v1428_v26  ;;  %v1572_v60 = vmax.f32 %v3227_v22, %v1500_v17  ;;  %v3228_v26 = vmax.f32 %v2769_v9, 0.0  ;;  %v3229_v17 = vmax.f32 %v2772_v41, 0.0 }
 0x14c   :  { %v3231_v22 = vmax.f32 %v2784_v53, 0.0  ;;  %v3235_v53 = vmax.f32 %v2808_v14, 0.0 }
 0x14d   :  { %v1590_v28 = vmax.f32 %v2534_v31, %v1554_v52  ;;  %v1608_v33 = vmax.f32 %v2536_v45, %v1572_v60  ;;  %v1555_v18 = vmax.f32 %v3228_v26, %v1429_v29  ;;  %v1573_v49 = vmax.f32 %v3229_v17, %v1501_v24  ;;  %v1950_v8 = vpop.f32.mrb[56].mxu0  ;;  %v2022_v21 = vpop.f32.mrb[56].mxu1 }
 0x14e   :  { %v1032_v9 = vadd.f32 %v1950_v8, %v2438_v38  ;;  %v1320_v41 = vadd.f32 %v2022_v21, %v2438_v38  ;;  %v1023_v29 = vpop.f32.mrb[57].mxu0  ;;  %v1311_v24 = vpop.f32.mrb[57].mxu1 }
 0x14f   :  { %1627 = vst.msk [vmem:[%s3184_s3] sm:$0xff] %vm1626_vm3, %v1590_v28  ;;  %1645 = vst.msk [vmem:[%s3184_s3 + $0x90] sm:$0xff] %vm1626_vm3, %v1608_v33  ;;  %v1591_v31 = vmax.f32 %v2550_v58, %v1555_v18  ;;  %v1609_v45 = vmax.f32 %v2552_v61, %v1573_v49  ;;  %v1024_v28 = vadd.f32 %v2438_v38, %v1023_v29  ;;  %v1951_v17 = vpop.f32.mrb[58].mxu0  ;;  %v2023_v33 = vpop.f32.mrb[58].mxu1 }
 0x150   :  { %v1312_v26 = vadd.f32 %v2438_v38, %v1311_v24  ;;  %v1432_v58 = vmax.f32 %v1032_v9, 0.0  ;;  %v1504_v61 = vmax.f32 %v1320_v41, 0.0  ;;  %v1035_v21 = vadd.f32 %v1951_v17, %v2438_v38  ;;  %v1026_v49 = vpop.f32.mrb[59].mxu0  ;;  %v1314_v8 = vpop.f32.mrb[59].mxu1 }
 0x151   :  { %1628 = vst.msk [vmem:[%s3184_s3 + $0x8] sm:$0xff] %vm1626_vm3, %v1591_v31  ;;  %1646 = vst.msk [vmem:[%s3184_s3 + $0x98] sm:$0xff] %vm1626_vm3, %v1609_v45  ;;  %v1323_v18 = vadd.f32 %v2023_v33, %v2438_v38  ;;  %v1430_v29 = vmax.f32 %v1024_v28, 0.0  ;;  %v1027_v54 = vadd.f32 %v2438_v38, %v1026_v49  ;;  %v1315_v60 = vadd.f32 %v2438_v38, %v1314_v8 }
 0x152   :  { %v1502_v24 = vmax.f32 %v1312_v26, 0.0  ;;  %v3230_v31 = vmax.f32 %v2781_v7, 0.0  ;;  %v1576_v45 = vmax.f32 %v3231_v22, %v1504_v61  ;;  %v1433_v9 = vmax.f32 %v1035_v21, 0.0 }
 0x153   :  { %v1505_v41 = vmax.f32 %v1323_v18, 0.0  ;;  %v3232_v17 = vmax.f32 %v2751_v62, 0.0  ;;  %v3233_v33 = vmax.f32 %v2754_v43, 0.0  ;;  %v1431_v28 = vmax.f32 %v1027_v54, 0.0 }
 0x154   :  { %v1558_v52 = vmax.f32 %v3230_v31, %v1432_v58  ;;  %v1503_v26 = vmax.f32 %v1315_v60, 0.0  ;;  %v1612_v8 = vmax.f32 %v2572_v2, %v1576_v45  ;;  %v3234_v7 = vmax.f32 %v2805_v35, 0.0 }
 0x155   :  { %v1556_v44 = vmax.f32 %v3232_v17, %v1430_v29  ;;  %v1574_v27 = vmax.f32 %v3233_v33, %v1502_v24  ;;  %v1577_v22 = vmax.f32 %v3235_v53, %v1505_v41  ;;  %v3236_v21 = vmax.f32 %v2763_v4, 0.0  ;;  %v1954_v18 = vpop.f32.mrb[60].mxu0 }
 0x156   :  { %v1594_v49 = vmax.f32 %v2570_v20, %v1558_v52  ;;  %v1559_v58 = vmax.f32 %v3234_v7, %v1433_v9  ;;  %v3237_v54 = vmax.f32 %v2766_v56, 0.0  ;;  %v2026_v20 = vpop.f32.mrb[60].mxu1  ;;  %1649 = vst.msk [vmem:[%s3184_s3 + $0xb0] sm:$0xff] %vm1626_vm3, %v1612_v8  ;;  %v1039_v56 = vpop.f32.mrb[61].mxu0  ;;  %v3240_v53 = vmax.f32 %v2775_v55, 0.0 }
 0x157   :  { %v1592_v61 = vmax.f32 %v2576_v16, %v1556_v44  ;;  %v1610_v62 = vmax.f32 %v2580_v1, %v1574_v27  ;;  %v1557_v43 = vmax.f32 %v3236_v21, %v1431_v28  ;;  %v1613_v16 = vmax.f32 %v2592_v37, %v1577_v22  ;;  %v1327_v4 = vpop.f32.mrb[61].mxu1  ;;  %v1955_v44 = vpop.f32.mrb[62].mxu0 }
 0x158   :  { %v1575_v60 = vmax.f32 %v3237_v54, %v1503_v26  ;;  %1631 = vst.msk [vmem:[%s3184_s3 + $0x20] sm:$0xff] %vm1626_vm3, %v1594_v49  ;;  %v1595_v2 = vmax.f32 %v2590_v10, %v1559_v58  ;;  %v1048_v1 = vadd.f32 %v1954_v18, %v2438_v38  ;;  %v1336_v14 = vadd.f32 %v2026_v20, %v2438_v38  ;;  %v2027_v52 = vpop.f32.mrb[62].mxu1  ;;  %v1042_v31 = vpop.f32.mrb[63].mxu0 }
 0x159   :  { %1629 = vst.msk [vmem:[%s3184_s3 + $0x10] sm:$0xff] %vm1626_vm3, %v1592_v61  ;;  %1647 = vst.msk [vmem:[%s3184_s3 + $0xa0] sm:$0xff] %vm1626_vm3, %v1610_v62  ;;  %v1593_v10 = vmax.f32 %v2604_v39, %v1557_v43  ;;  %v1040_v35 = vadd.f32 %v2438_v38, %v1039_v56  ;;  %v1328_v27 = vadd.f32 %v2438_v38, %v1327_v4  ;;  %v1330_v45 = vpop.f32.mrb[63].mxu1  ;;  %v3238_v28 = vmax.f32 %v2817_v15, 0.0 }
 0x15a   :  { %v1611_v37 = vmax.f32 %v2608_v40, %v1575_v60  ;;  %1632 = vst.msk [vmem:[%s3184_s3 + $0x28] sm:$0xff] %vm1626_vm3, %v1595_v2  ;;  %1650 = vst.msk [vmem:[%s3184_s3 + $0xb8] sm:$0xff] %vm1626_vm3, %v1613_v16  ;;  %v1436_v29 = vmax.f32 %v1048_v1, 0.0  ;;  %v1508_v39 = vmax.f32 %v1336_v14, 0.0  ;;  %v1051_v40 = vadd.f32 %v1955_v44, %v2438_v38 }
 0x15b   :  { %v1339_v24 = vadd.f32 %v2027_v52, %v2438_v38  ;;  %1630 = vst.msk [vmem:[%s3184_s3 + $0x18] sm:$0xff] %vm1626_vm3, %v1593_v10  ;;  %v1434_v9 = vmax.f32 %v1040_v35, 0.0  ;;  %v1506_v41 = vmax.f32 %v1328_v27, 0.0  ;;  %v1043_v17 = vadd.f32 %v2438_v38, %v1042_v31  ;;  %v3246_v31 = vld [vmem:[#allocation24_spill] sm:$0xff] }
 0x15c   :  { %1648 = vst.msk [vmem:[%s3184_s3 + $0xa8] sm:$0xff] %vm1626_vm3, %v1611_v37  ;;  %v1331_v33 = vadd.f32 %v2438_v38, %v1330_v45  ;;  %v1562_v26 = vmax.f32 %v3238_v28, %v1436_v29  ;;  %v3239_v49 = vmax.f32 %v2820_v50, 0.0  ;;  %v1437_v7 = vmax.f32 %v1051_v40, 0.0 }
 0x15d   :  { %v1509_v58 = vmax.f32 %v1339_v24, 0.0  ;;  %v1560_v22 = vmax.f32 %v3240_v53, %v1434_v9  ;;  %v3241_v61 = vmax.f32 %v2778_v30, 0.0  ;;  %v1435_v21 = vmax.f32 %v1043_v17, 0.0  ;;  %v1958_v56 = vpop.f32.mrb[64].mxu0 }
 0x15e   :  { %v1580_v8 = vmax.f32 %v3239_v49, %v1508_v39  ;;  %v1507_v43 = vmax.f32 %v1331_v33, 0.0  ;;  %v1598_v54 = vmax.f32 %v2636_v12, %v1562_v26  ;;  %v3242_v15 = vmax.f32 %v2829_v57, 0.0  ;;  %v2030_v12 = vpop.f32.mrb[64].mxu1  ;;  %v3250_v49 = vld [vmem:[#allocation18_spill] sm:$0xff] }
 0x15f   :  { %v1578_v62 = vmax.f32 %v3241_v61, %v1506_v41  ;;  %v3243_v50 = vmax.f32 %v2832_v23, 0.0  ;;  %v1596_v2 = vmax.f32 %v2644_v59, %v1560_v22  ;;  %v3244_v16 = vmax.f32 %v2797_v5, 0.0  ;;  %v1055_v5 = vpop.f32.mrb[65].mxu0  ;;  %v1343_v57 = vpop.f32.mrb[65].mxu1  ;;  %v3248_v41 = vld [vmem:[#allocation25_spill] sm:$0xff] }
 0x160   :  { %v1616_v60 = vmax.f32 %v2640_v19, %v1580_v8  ;;  %v1563_v18 = vmax.f32 %v3242_v15, %v1437_v7  ;;  %v3245_v1 = vmax.f32 %v2800_v13, 0.0  ;;  %1635 = vst.msk [vmem:[%s3184_s3 + $0x40] sm:$0xff] %vm1626_vm3, %v1598_v54  ;;  %v1352_v13 = vadd.f32 %v2030_v12, %v2438_v38  ;;  %v1959_v10 = vpop.f32.mrb[66].mxu0  ;;  %v2031_v37 = vpop.f32.mrb[66].mxu1  ;;  %v3255_v54 = vld [vmem:[#allocation3_spill] sm:$0xff] }
 0x161   :  { %v1581_v20 = vmax.f32 %v3243_v50, %v1509_v58  ;;  %v1614_v55 = vmax.f32 %v2648_v42, %v1578_v62  ;;  %v1561_v30 = vmax.f32 %v3244_v16, %v1435_v21  ;;  %v1064_v42 = vadd.f32 %v1958_v56, %v2438_v38  ;;  %1633 = vst.msk [vmem:[%s3184_s3 + $0x30] sm:$0xff] %vm1626_vm3, %v1596_v2  ;;  %v1058_v44 = vpop.f32.mrb[67].mxu0  ;;  %v1346_v52 = vpop.f32.mrb[67].mxu1  ;;  %v3252_v58 = vld [vmem:[#allocation19_spill] sm:$0xff]  ;;  %v3254_v21 = vld [vmem:[#allocation2_spill] sm:$0xff]  ;;  %v3261_v56 = vld [vmem:[#allocation21_spill] sm:$0xff] }
 0x162   :  { %v1579_v14 = vmax.f32 %v3245_v1, %v1507_v43  ;;  %1653 = vst.msk [vmem:[%s3184_s3 + $0xd0] sm:$0xff] %vm1626_vm3, %v1616_v60  ;;  %v1599_v19 = vmax.f32 %v2654_v36, %v1563_v18  ;;  %v1056_v23 = vadd.f32 %v2438_v38, %v1055_v5  ;;  %v1344_v4 = vadd.f32 %v2438_v38, %v1343_v57 }
 0x163   :  { %v1617_v59 = vmax.f32 %v2658_v47, %v1581_v20  ;;  %1651 = vst.msk [vmem:[%s3184_s3 + $0xc0] sm:$0xff] %vm1626_vm3, %v1614_v55  ;;  %v1597_v36 = vmax.f32 %v2664_v32, %v1561_v30  ;;  %v1440_v35 = vmax.f32 %v1064_v42, 0.0  ;;  %v1512_v32 = vmax.f32 %v1352_v13, 0.0  ;;  %v3257_v20 = vld [vmem:[#allocation4_spill] sm:$0xff]  ;;  %v3258_v55 = vld [vmem:[#allocation5_spill] sm:$0xff] }
 0x164   :  { %v1615_v47 = vmax.f32 %v2668_v48, %v1579_v14  ;;  %1636 = vst.msk [vmem:[%s3184_s3 + $0x48] sm:$0xff] %vm1626_vm3, %v1599_v19  ;;  %v1067_v48 = vadd.f32 %v1959_v10, %v2438_v38  ;;  %v1355_v27 = vadd.f32 %v2031_v37, %v2438_v38  ;;  %v1438_v29 = vmax.f32 %v1056_v23, 0.0  ;;  %v3259_v30 = vld [vmem:[#allocation20_spill] sm:$0xff]  ;;  %v3266_v10 = vld [vmem:[#allocation9_spill] sm:$0xff] }
 0x165   :  { %1654 = vst.msk [vmem:[%s3184_s3 + $0xd8] sm:$0xff] %vm1626_vm3, %v1617_v59  ;;  %1634 = vst.msk [vmem:[%s3184_s3 + $0x38] sm:$0xff] %vm1626_vm3, %v1597_v36  ;;  %v1510_v39 = vmax.f32 %v1344_v4, 0.0  ;;  %v1059_v40 = vadd.f32 %v2438_v38, %v1058_v44  ;;  %v1347_v24 = vadd.f32 %v2438_v38, %v1346_v52  ;;  %v3247_v45 = vmax.f32 %v3246_v31, 0.0  ;;  %v1962_v59 = vpop.f32.mrb[68].mxu0  ;;  %v2034_v42 = vpop.f32.mrb[68].mxu1 }
 0x166   :  { %1652 = vst.msk [vmem:[%s3184_s3 + $0xc8] sm:$0xff] %vm1626_vm3, %v1615_v47  ;;  %v3249_v17 = vmax.f32 %v3248_v41, 0.0  ;;  %v1441_v28 = vmax.f32 %v1067_v48, 0.0  ;;  %v1513_v26 = vmax.f32 %v1355_v27, 0.0  ;;  %v3251_v8 = vmax.f32 %v3250_v49, 0.0  ;;  %v1071_v36 = vpop.f32.mrb[69].mxu0 }
 0x167   :  { %v1566_v9 = vmax.f32 %v3247_v45, %v1440_v35  ;;  %v3253_v53 = vmax.f32 %v3252_v58, 0.0  ;;  %v1439_v61 = vmax.f32 %v1059_v40, 0.0  ;;  %v1511_v62 = vmax.f32 %v1347_v24, 0.0  ;;  %v1359_v47 = vpop.f32.mrb[69].mxu1  ;;  %v3265_v23 = vld [vmem:[#allocation8_spill] sm:$0xff]  ;;  %v1963_v48 = vpop.f32.mrb[70].mxu0 }
 0x168   :  { %v1584_v33 = vmax.f32 %v3249_v17, %v1512_v32  ;;  %v1564_v7 = vmax.f32 %v3251_v8, %v1438_v29  ;;  %v1567_v15 = vmax.f32 %v1423_v0, %v1441_v28  ;;  %v3256_v18 = vmax.f32 %v2876_v63, 0.0  ;;  %v3264_v0 = vld [vmem:[#allocation7_spill] sm:$0xff]  ;;  %v2035_v27 = vpop.f32.mrb[70].mxu1  ;;  %v2115_v29 = vld [vmem:[%s3183_s2] ss:$0 sm:$0xff]  ;;  %v1074_v40 = vpop.f32.mrb[71].mxu0 }
 0x169   :  { %v1582_v22 = vmax.f32 %v3253_v53, %v1510_v39  ;;  %v1602_v43 = vmax.f32 %v3254_v21, %v1566_v9  ;;  %v3260_v1 = vmax.f32 %v3259_v30, 0.0  ;;  %v3262_v12 = vmax.f32 %v3261_v56, 0.0  ;;  %v1362_v24 = vpop.f32.mrb[71].mxu1 }
 0x16a   :  { %v1620_v60 = vmax.f32 %v3255_v54, %v1584_v33  ;;  %v1585_v50 = vmax.f32 %v3256_v18, %v1513_v26  ;;  %v1600_v2 = vmax.f32 %v3257_v20, %v1564_v7  ;;  %v1603_v63 = vmax.f32 %v3263_v3, %v1567_v15  ;;  %v3269_v7 = vld [vmem:[#allocation22_spill] sm:$0xff]  ;;  %v3274_v15 = vld [vmem:[#allocation11_spill] sm:$0xff] }
 0x16b   :  { %v1618_v16 = vmax.f32 %v3258_v55, %v1582_v22  ;;  %v1565_v14 = vmax.f32 %v3260_v1, %v1439_v61  ;;  %v1583_v19 = vmax.f32 %v3262_v12, %v1511_v62  ;;  %1639 = vst.msk [vmem:[%s3184_s3 + $0x60] sm:$0xff] %vm1626_vm3, %v1602_v43  ;;  %v1080_v5 = vadd.f32 %v1962_v59, %v2438_v38  ;;  %v3271_v22 = vld [vmem:[#allocation23_spill] sm:$0xff]  ;;  %v3273_v54 = vld [vmem:[#allocation10_spill] sm:$0xff] }
 0x16c   :  { %1657 = vst.msk [vmem:[%s3184_s3 + $0xf0] sm:$0xff] %vm1626_vm3, %v1620_v60  ;;  %v1621_v13 = vmax.f32 %v3264_v0, %v1585_v50  ;;  %v1368_v57 = vadd.f32 %v2034_v42, %v2438_v38  ;;  %1637 = vst.msk [vmem:[%s3184_s3 + $0x50] sm:$0xff] %vm1626_vm3, %v1600_v2  ;;  %v1072_v35 = vadd.f32 %v2438_v38, %v1071_v36  ;;  %v3267_v17 = vmax.f32 %v2879_v34, 0.0  ;;  %v3277_v2 = vld [vmem:[#allocation12_spill] sm:$0xff]  ;;  %v3284_v42 = vld [vmem:[#allocation17_spill] sm:$0xff] }
 0x16d   :  { %1655 = vst.msk [vmem:[%s3184_s3 + $0xe0] sm:$0xff] %vm1626_vm3, %v1618_v16  ;;  %v1601_v4 = vmax.f32 %v3265_v23, %v1565_v14  ;;  %v1619_v37 = vmax.f32 %v3266_v10, %v1583_v19  ;;  %v1360_v32 = vadd.f32 %v2438_v38, %v1359_v47  ;;  %1640 = vst.msk [vmem:[%s3184_s3 + $0x68] sm:$0xff] %vm1626_vm3, %v1603_v63  ;;  %v1444_v44 = vmax.f32 %v1080_v5, 0.0  ;;  %v3278_v16 = vld [vmem:[#allocation13_spill] sm:$0xff]  ;;  %v3282_v19 = vld [vmem:[#allocation15_spill] sm:$0xff] }
 0x16e   :  { %1658 = vst.msk [vmem:[%s3184_s3 + $0xf8] sm:$0xff] %vm1626_vm3, %v1621_v13  ;;  %v1516_v52 = vmax.f32 %v1368_v57, 0.0  ;;  %v1083_v39 = vadd.f32 %v2115_v29, %v1963_v48  ;;  %v1371_v38 = vadd.f32 %v2115_v29, %v2035_v27  ;;  %v1442_v31 = vmax.f32 %v1072_v35, 0.0 }
 0x16f   :  { %1638 = vst.msk [vmem:[%s3184_s3 + $0x58] sm:$0xff] %vm1626_vm3, %v1601_v4  ;;  %1656 = vst.msk [vmem:[%s3184_s3 + $0xe8] sm:$0xff] %vm1626_vm3, %v1619_v37  ;;  %v1514_v45 = vmax.f32 %v1360_v32, 0.0  ;;  %v1075_v9 = vadd.f32 %v2115_v29, %v1074_v40  ;;  %v1363_v41 = vadd.f32 %v2115_v29, %v1362_v24  ;;  %v1570_v33 = vmax.f32 %v3267_v17, %v1444_v44 }
 0x170   :  { %v3268_v28 = vmax.f32 %v2882_v51, 0.0  ;;  %v1445_v49 = vmax.f32 %v1083_v39, 0.0  ;;  %v1517_v8 = vmax.f32 %v1371_v38, 0.0  ;;  %v3270_v58 = vmax.f32 %v3269_v7, 0.0 }
 0x171   :  { %v3272_v61 = vmax.f32 %v3271_v22, 0.0  ;;  %v1443_v21 = vmax.f32 %v1075_v9, 0.0  ;;  %v1515_v43 = vmax.f32 %v1363_v41, 0.0  ;;  %v1606_v60 = vmax.f32 %v3273_v54, %v1570_v33 }
 0x172   :  { %v1588_v26 = vmax.f32 %v3268_v28, %v1516_v52  ;;  %v1568_v53 = vmax.f32 %v3270_v58, %v1442_v31  ;;  %v3275_v34 = vmax.f32 %v2891_v46, 0.0  ;;  %v3276_v51 = vmax.f32 %v2894_v25, 0.0  ;;  %v3281_v46 = vld [vmem:[#allocation14_spill] sm:$0xff] }
 0x173   :  { %v1586_v62 = vmax.f32 %v3272_v61, %v1514_v45  ;;  %v3279_v1 = vmax.f32 %v2865_v6, 0.0  ;;  %v3280_v56 = vmax.f32 %v2868_v11, 0.0  ;;  %1643 = vst.msk [vmem:[%s3184_s3 + $0x80] sm:$0xff] %vm1626_vm3, %v1606_v60  ;;  %v3283_v6 = vld [vmem:[#allocation16_spill] sm:$0xff] }
 0x174   :  { %v1624_v18 = vmax.f32 %v3274_v15, %v1588_v26  ;;  %v1571_v50 = vmax.f32 %v3275_v34, %v1445_v49  ;;  %v1589_v20 = vmax.f32 %v3276_v51, %v1517_v8  ;;  %v1604_v55 = vmax.f32 %v3277_v2, %v1568_v53 }
 0x175   :  { %v1622_v30 = vmax.f32 %v3278_v16, %v1586_v62  ;;  %v1569_v14 = vmax.f32 %v3279_v1, %v1443_v21  ;;  %v1587_v12 = vmax.f32 %v3280_v56, %v1515_v43 }
 0x176   :  { %1661 = vst.msk [vmem:[%s3184_s3 + $0x110] sm:$0xff] %vm1626_vm3, %v1624_v18  ;;  %v1607_v25 = vmax.f32 %v3281_v46, %v1571_v50  ;;  %v1625_v59 = vmax.f32 %v3282_v19, %v1589_v20  ;;  %1641 = vst.msk [vmem:[%s3184_s3 + $0x70] sm:$0xff] %vm1626_vm3, %v1604_v55 }
 0x177   :  { %1659 = vst.msk [vmem:[%s3184_s3 + $0x100] sm:$0xff] %vm1626_vm3, %v1622_v30  ;;  %v1605_v11 = vmax.f32 %v3283_v6, %v1569_v14  ;;  %v1623_v3 = vmax.f32 %v3284_v42, %v1587_v12 }
 0x178   :  { %1644 = vst.msk [vmem:[%s3184_s3 + $0x88] sm:$0xff] %vm1626_vm3, %v1607_v25  ;;  %1662 = vst.msk [vmem:[%s3184_s3 + $0x118] sm:$0xff] %vm1626_vm3, %v1625_v59 }
 0x179   :  { %1642 = vst.msk [vmem:[%s3184_s3 + $0x78] sm:$0xff] %vm1626_vm3, %v1605_v11  ;;  %1660 = vst.msk [vmem:[%s3184_s3 + $0x108] sm:$0xff] %vm1626_vm3, %v1623_v3 }

// kernel: lenet_forward.4
= control target key start
LH: loop header
LB: loop body
LE: loop exit
PB: predicated region body
PF: predicated region fallthrough
CT: control target
= control target key end

     0   :  { %v439_v0 = vmov 0   ;;  %vm186_vm0 = vcmask 179200   ;;  %vm211_vm1 = vcmask 1042432   ;;  %vm340_vm2 = vcmask 130048   ;;  %s561_s1 = inlined_call_operand.vmem [shape: bf16[150,16], index: 1, kind: input, shape index: {}]   ;;  %s562_s0 = inlined_call_operand.vmem [shape: bf16[2,4,16,150], index: 0, kind: input, shape index: {}]   ;;  %s563_s2 = inlined_call_operand.vmem [shape: f32[1,16], index: 2, kind: input, shape index: {}]   ;;  %s564_s3 = inlined_call_operand.vmem [shape: f32[2,16,16], index: 3, kind: output, shape index: {}]  }
   0x1   :  { %215 = vmatprep.subr.bf16.mxu0 %v439_v0  ;;  %384 = vmatprep.subr.bf16.mxu1 %v439_v0  ;;  %v405_v1 = vld [vmem:[%s561_s1] sm:$0xff]   ;;  %v406_v2 = vld [vmem:[%s561_s1 + $0x8] sm:$0xff]   ;;  %v407_v3 = vld [vmem:[%s561_s1 + $0x10] sm:$0xff]  }
   0x2   :  { %216 = vmatpush1.bf16.msra.mxu0 %v405_v1  ;;  %394 = vmatpush1.bf16.msra.mxu1 %v405_v1  ;;  %v408_v4 = vld [vmem:[%s561_s1 + $0x18] sm:$0xff]   ;;  %v417_v5 = vld [vmem:[%s562_s0 + $0x4] ss:$8 sps:$4 sm:$0xff]   ;;  %v411_v9 = vld [vmem:[%s561_s1 + $0x30] sm:$0xff]  }
   0x3   :  { %217 = vmatprep.subr.bf16.mxu0 %v439_v0  ;;  %385 = vmatprep.subr.bf16.mxu1 %v439_v0  ;;  %v420_v6 = vld [vmem:[%s562_s0 + $0x44] ss:$8 sps:$4 sm:$0xff]   ;;  %v412_v10 = vld [vmem:[%s561_s1 + $0x38] sm:$0xff]   ;;  %v414_v12 = vld [vmem:[%s561_s1 + $0x48] ss:$0 sps:$4 sm:$0x77]  }
   0x4   :  { %376 = vmatprep.mubr.msk.bf16.mxu0 %vm186_vm0, %v417_v5  ;;  %v409_v7 = vld [vmem:[%s561_s1 + $0x20] sm:$0xff]   ;;  %380 = vmatprep.mubr.msk.bf16.mxu1 %vm186_vm0, %v420_v6  ;;  %v410_v8 = vld [vmem:[%s561_s1 + $0x28] sm:$0xff]   ;;  %v213_v13 = vsel %vm211_vm1, %v414_v12, 0  ;;  %v421_v16 = vld [vmem:[%s562_s0 + $0x14] ss:$8 sps:$4 sm:$0xff]  }
   0x5   :  { %v413_v11 = vld [vmem:[%s561_s1 + $0x40] sm:$0xff]   ;;  %v423_v17 = vld [vmem:[%s562_s0 + $0x54] ss:$8 sps:$4 sm:$0xff]   ;;  %v425_v18 = vld [vmem:[%s562_s0 + $0x10] ss:$8 sps:$4 sm:$0xff]  }
   0x6   :  { %218 = vmatpush1.bf16.msra.mxu0 %v406_v2  ;;  %395 = vmatpush1.bf16.msra.mxu1 %v406_v2  ;;  %v415_v14 = vld [vmem:[%s562_s0] ss:$8 sps:$4 sm:$0xff]   ;;  %v426_v19 = vld [vmem:[%s562_s0 + $0x50] ss:$8 sps:$4 sm:$0xff]   ;;  %v427_v20 = vld [vmem:[%s562_s0 + $0x24] ss:$8 sps:$4 sm:$0xff]  }
   0x7   :  { %219 = vmatprep.subr.bf16.mxu0 %v439_v0  ;;  %386 = vmatprep.subr.bf16.mxu1 %v439_v0  ;;  %v418_v15 = vld [vmem:[%s562_s0 + $0x40] ss:$8 sps:$4 sm:$0xff]   ;;  %v429_v21 = vld [vmem:[%s562_s0 + $0x64] ss:$8 sps:$4 sm:$0xff]   ;;  %v433_v24 = vld [vmem:[%s562_s0 + $0x34] ss:$8 sps:$4 sm:$0xff]  }
   0x8   :  { %v431_v22 = vld [vmem:[%s562_s0 + $0x20] ss:$8 sps:$4 sm:$0xff]   ;;  %v435_v25 = vld [vmem:[%s562_s0 + $0x74] ss:$8 sps:$4 sm:$0xff]   ;;  %v437_v26 = vld [vmem:[%s562_s0 + $0x30] ss:$8 sps:$4 sm:$0xff]  }
   0x9   :  { %v432_v23 = vld [vmem:[%s562_s0 + $0x60] ss:$8 sps:$4 sm:$0xff]   ;;  %v438_v27 = vld [vmem:[%s562_s0 + $0x70] ss:$8 sps:$4 sm:$0xff]  }
   0xa   :  { %220 = vmatpush1.bf16.msra.mxu0 %v407_v3  ;;  %396 = vmatpush1.bf16.msra.mxu1 %v407_v3  ;;  %v349_v34 = vld [vmem:[%s563_s2] ss:$0 sm:$0xff] }
   0xb   :  { %221 = vmatprep.subr.bf16.mxu0 %v439_v0  ;;  %387 = vmatprep.subr.bf16.mxu1 %v439_v0 }
   0xe   :  { %222 = vmatpush1.bf16.msra.mxu0 %v408_v4  ;;  %397 = vmatpush1.bf16.msra.mxu1 %v408_v4 }
   0xf   :  { %223 = vmatprep.subr.bf16.mxu0 %v439_v0  ;;  %388 = vmatprep.subr.bf16.mxu1 %v439_v0 }
  0x12   :  { %224 = vmatpush1.bf16.msra.mxu0 %v409_v7  ;;  %398 = vmatpush1.bf16.msra.mxu1 %v409_v7 }
  0x13   :  { %225 = vmatprep.subr.bf16.mxu0 %v439_v0  ;;  %389 = vmatprep.subr.bf16.mxu1 %v439_v0 }
  0x16   :  { %226 = vmatpush1.bf16.msra.mxu0 %v410_v8  ;;  %399 = vmatpush1.bf16.msra.mxu1 %v410_v8 }
  0x17   :  { %227 = vmatprep.subr.bf16.mxu0 %v439_v0  ;;  %390 = vmatprep.subr.bf16.mxu1 %v439_v0 }
  0x1a   :  { %228 = vmatpush1.bf16.msra.mxu0 %v411_v9  ;;  %400 = vmatpush1.bf16.msra.mxu1 %v411_v9 }
  0x1b   :  { %229 = vmatprep.subr.bf16.mxu0 %v439_v0  ;;  %391 = vmatprep.subr.bf16.mxu1 %v439_v0 }
  0x1e   :  { %230 = vmatpush1.bf16.msra.mxu0 %v412_v10  ;;  %401 = vmatpush1.bf16.msra.mxu1 %v412_v10 }
  0x1f   :  { %231 = vmatprep.subr.bf16.mxu0 %v439_v0  ;;  %392 = vmatprep.subr.bf16.mxu1 %v439_v0 }
  0x22   :  { %232 = vmatpush1.bf16.msra.mxu0 %v413_v11  ;;  %402 = vmatpush1.bf16.msra.mxu1 %v413_v11 }
  0x23   :  { %233 = vmatprep.subr.bf16.mxu0 %v439_v0  ;;  %393 = vmatprep.subr.bf16.mxu1 %v439_v0 }
  0x26   :  { %234 = vmatpush1.bf16.msra.mxu0 %v213_v13  ;;  %403 = vmatpush1.bf16.msra.mxu1 %v213_v13 }
  0x29   :  { %248 = vmatmul.mubr.bf16.vlgmr.msra.gmra.mrb[0].mxu0 %v415_v14  ;;  %280 = vmatmul.mubr.bf16.vlgmr.msra.gmra.mrb[0].mxu1 %v418_v15 }
  0x2a   :  { %377 = vmatprep.mubr.msk.bf16.mxu0 %vm186_vm0, %v421_v16  ;;  %381 = vmatprep.mubr.msk.bf16.mxu1 %vm186_vm0, %v423_v17 }
  0x31   :  { %256 = vmatmul.mubr.bf16.gmra.mrb[4].mxu0 %v425_v18  ;;  %288 = vmatmul.mubr.bf16.gmra.mrb[4].mxu1 %v426_v19 }
  0x32   :  { %378 = vmatprep.mubr.msk.bf16.mxu0 %vm186_vm0, %v427_v20  ;;  %382 = vmatprep.mubr.msk.bf16.mxu1 %vm186_vm0, %v429_v21 }
  0x39   :  { %264 = vmatmul.mubr.bf16.gmra.mrb[8].mxu0 %v431_v22  ;;  %296 = vmatmul.mubr.bf16.gmra.mrb[8].mxu1 %v432_v23 }
  0x3a   :  { %379 = vmatprep.mubr.msk.bf16.mxu0 %vm186_vm0, %v433_v24  ;;  %383 = vmatprep.mubr.msk.bf16.mxu1 %vm186_vm0, %v435_v25 }
  0x41   :  { %272 = vmatmul.mubr.bf16.gmra.mrb[12].mxu0 %v437_v26  ;;  %304 = vmatmul.mubr.bf16.gmra.mrb[12].mxu1 %v438_v27 }
  0xfc   :  { %v249_v28 = vpop.f32.mrb[0].mxu0  ;;  %v281_v29 = vpop.f32.mrb[0].mxu1 }
  0xfd   :  { %v251_v30 = vpop.f32.mrb[1].mxu0  ;;  %v283_v31 = vpop.f32.mrb[1].mxu1  ;;  %v250_v37 = vadd.f32 %v349_v34, %v249_v28  ;;  %v282_v38 = vadd.f32 %v349_v34, %v281_v29 }
  0xfe   :  { %v252_v32 = vpop.f32.mrb[2].mxu0  ;;  %v284_v33 = vpop.f32.mrb[2].mxu1 }
  0xff   :  { %v254_v35 = vpop.f32.mrb[3].mxu0  ;;  %v286_v36 = vpop.f32.mrb[3].mxu1  ;;  %v253_v39 = vadd.f32 %v349_v34, %v252_v32  ;;  %v285_v40 = vadd.f32 %v349_v34, %v284_v33  ;;  %v312_v47 = vmax.f32 %v250_v37, 0.0  ;;  %v320_v48 = vmax.f32 %v282_v38, 0.0 }
 0x101   :  { %v313_v57 = vmax.f32 %v253_v39, 0.0  ;;  %v321_v58 = vmax.f32 %v285_v40, 0.0 }
 0x104   :  { %v257_v41 = vpop.f32.mrb[4].mxu0  ;;  %v289_v42 = vpop.f32.mrb[4].mxu1 }
 0x105   :  { %v258_v43 = vadd.f32 %v349_v34, %v257_v41  ;;  %v290_v44 = vadd.f32 %v349_v34, %v289_v42  ;;  %v259_v45 = vpop.f32.mrb[5].mxu0  ;;  %v291_v46 = vpop.f32.mrb[5].mxu1 }
 0x106   :  { %v260_v49 = vpop.f32.mrb[6].mxu0  ;;  %v292_v50 = vpop.f32.mrb[6].mxu1 }
 0x107   :  { %v314_v51 = vmax.f32 %v258_v43, 0.0  ;;  %v322_v52 = vmax.f32 %v290_v44, 0.0  ;;  %v261_v53 = vadd.f32 %v349_v34, %v260_v49  ;;  %v293_v54 = vadd.f32 %v349_v34, %v292_v50  ;;  %v262_v55 = vpop.f32.mrb[7].mxu0  ;;  %v294_v56 = vpop.f32.mrb[7].mxu1 }
 0x109   :  { %v328_v59 = vmax.f32 %v312_v47, %v314_v51  ;;  %v330_v60 = vmax.f32 %v320_v48, %v322_v52  ;;  %v315_v61 = vmax.f32 %v261_v53, 0.0  ;;  %v323_v62 = vmax.f32 %v293_v54, 0.0 }
 0x10b   :  { %v329_v63 = vmax.f32 %v313_v57, %v315_v61  ;;  %v331_v0 = vmax.f32 %v321_v58, %v323_v62 }
 0x10c   :  { %v265_v1 = vpop.f32.mrb[8].mxu0  ;;  %v297_v2 = vpop.f32.mrb[8].mxu1 }
 0x10d   :  { %v267_v3 = vpop.f32.mrb[9].mxu0  ;;  %v299_v4 = vpop.f32.mrb[9].mxu1  ;;  %v266_v9 = vadd.f32 %v349_v34, %v265_v1  ;;  %v298_v10 = vadd.f32 %v349_v34, %v297_v2 }
 0x10e   :  { %v268_v5 = vpop.f32.mrb[10].mxu0  ;;  %v300_v6 = vpop.f32.mrb[10].mxu1 }
 0x10f   :  { %v270_v7 = vpop.f32.mrb[11].mxu0  ;;  %v302_v8 = vpop.f32.mrb[11].mxu1  ;;  %v269_v11 = vadd.f32 %v349_v34, %v268_v5  ;;  %v301_v12 = vadd.f32 %v349_v34, %v300_v6  ;;  %v316_v19 = vmax.f32 %v266_v9, 0.0  ;;  %v324_v20 = vmax.f32 %v298_v10, 0.0 }
 0x111   :  { %v317_v29 = vmax.f32 %v269_v11, 0.0  ;;  %v325_v30 = vmax.f32 %v301_v12, 0.0 }
 0x114   :  { %v273_v13 = vpop.f32.mrb[12].mxu0  ;;  %v305_v14 = vpop.f32.mrb[12].mxu1 }
 0x115   :  { %v274_v15 = vadd.f32 %v349_v34, %v273_v13  ;;  %v306_v16 = vadd.f32 %v349_v34, %v305_v14  ;;  %v275_v17 = vpop.f32.mrb[13].mxu0  ;;  %v307_v18 = vpop.f32.mrb[13].mxu1 }
 0x116   :  { %v276_v21 = vpop.f32.mrb[14].mxu0  ;;  %v308_v22 = vpop.f32.mrb[14].mxu1 }
 0x117   :  { %v318_v23 = vmax.f32 %v274_v15, 0.0  ;;  %v326_v24 = vmax.f32 %v306_v16, 0.0  ;;  %v277_v25 = vadd.f32 %v349_v34, %v276_v21  ;;  %v309_v26 = vadd.f32 %v349_v34, %v308_v22  ;;  %v278_v27 = vpop.f32.mrb[15].mxu0  ;;  %v310_v28 = vpop.f32.mrb[15].mxu1 }
 0x119   :  { %v332_v31 = vmax.f32 %v316_v19, %v318_v23  ;;  %v334_v32 = vmax.f32 %v324_v20, %v326_v24  ;;  %v319_v33 = vmax.f32 %v277_v25, 0.0  ;;  %v327_v35 = vmax.f32 %v309_v26, 0.0 }
 0x11b   :  { %v336_v36 = vmax.f32 %v328_v59, %v332_v31  ;;  %v338_v37 = vmax.f32 %v330_v60, %v334_v32  ;;  %v333_v38 = vmax.f32 %v317_v29, %v319_v33  ;;  %v335_v39 = vmax.f32 %v325_v30, %v327_v35 }
 0x11d   :  { %341 = vst.msk [vmem:[%s564_s3] sm:$0xff] %vm340_vm2, %v336_v36  ;;  %343 = vst.msk [vmem:[%s564_s3 + $0x10] sm:$0xff] %vm340_vm2, %v338_v37  ;;  %v337_v34 = vmax.f32 %v329_v63, %v333_v38  ;;  %v339_v40 = vmax.f32 %v331_v0, %v335_v39 }
 0x11f   :  { %342 = vst.msk [vmem:[%s564_s3 + $0x8] sm:$0xff] %vm340_vm2, %v337_v34  ;;  %344 = vst.msk [vmem:[%s564_s3 + $0x18] sm:$0xff] %vm340_vm2, %v339_v40 }

// kernel: lenet_forward.5
= control target key start
LH: loop header
LB: loop body
LE: loop exit
PB: predicated region body
PF: predicated region fallthrough
CT: control target
= control target key end

     0   :  { %v630_v2 = vmov 0.0   ;;  %v80_v10 = vlaneseq  ;;  %v631_v14 = vmov 1966171168   ;;  %s804_s0 = inlined_call_operand.vmem [shape: bf16[2,256], index: 0, kind: input, shape index: {}]   ;;  %s805_s1 = inlined_call_operand.vmem [shape: bf16[256,120], index: 1, kind: input, shape index: {}]   ;;  %s806_s2 = inlined_call_operand.vmem [shape: f32[1,120], index: 2, kind: input, shape index: {}]   ;;  %s807_s3 = inlined_call_operand.vmem [shape: bf16[120,84], index: 3, kind: input, shape index: {}]   ;;  %s808_s4 = inlined_call_operand.vmem [shape: f32[1,84], index: 4, kind: input, shape index: {}]   ;;  %s809_s5 = inlined_call_operand.vmem [shape: bf16[84,128], index: 5, kind: input, shape index: {}]   ;;  %s810_s6 = inlined_call_operand.vmem [shape: f32[1,128], index: 6, kind: input, shape index: {}]   ;;  %s811_s7 = inlined_call_operand.hbm [shape: f32[2,128], index: 7, kind: output, shape index: {}]  }
   0x1   :  { %v576_v0 = vld [vmem:[%s805_s1 + $0x40] sm:$0xff]   ;;  %536 = vmatprep.subr.bf16.mxu1 %v630_v2  ;;  %v578_v3 = vld [vmem:[%s805_s1 + $0x48] sm:$0xff]   ;;  %v580_v5 = vld [vmem:[%s805_s1 + $0x50] sm:$0xff]   ;;  %v78_v15 = vunpack.c.l.s4 %v631_v14 }
   0x2   :  { %v577_v1 = vld [vmem:[%s805_s1] sm:$0xff]   ;;  %498 = vmatprep.subr.bf16.mxu0 %v576_v0  ;;  %v579_v4 = vld [vmem:[%s805_s1 + $0x8] sm:$0xff]   ;;  %v581_v6 = vld [vmem:[%s805_s1 + $0x10] sm:$0xff]   ;;  %v81_v16 = vshrl.u32 %v80_v10, 7 }
   0x3   :  { %499 = vmatpush3.bf16.msra.mxu0 %v577_v1  ;;  %v582_v7 = vld [vmem:[%s805_s1 + $0x58] sm:$0xff]   ;;  %v584_v9 = vld [vmem:[%s805_s1 + $0x60] sm:$0xff]   ;;  %v586_v12 = vld [vmem:[%s805_s1 + $0x68] sm:$0xff]   ;;  %v79_v20 = vunpack.c.0.s8 %v78_v15 }
   0x4   :  { %500 = vmatprep.subr.bf16.mxu0 %v578_v3  ;;  %v583_v8 = vld [vmem:[%s805_s1 + $0x18] sm:$0xff]   ;;  %v585_v11 = vld [vmem:[%s805_s1 + $0x20] sm:$0xff]   ;;  %v587_v18 = vld [vmem:[%s805_s1 + $0x28] sm:$0xff]  }
   0x5   :  { %v463_v13 = vld.sshfl [vmem:[%s804_s0] sm:$0x11 pattern:$0x75316420]  ;;  %v593_v21 = vld [vmem:[%s807_s3 + $0x8] sm:$0xff]   ;;  %v588_v22 = vld [vmem:[%s805_s1 + $0x70] sm:$0xff]   ;;  %v82_v24 = vsub.s32 %v79_v20, %v81_v16 }
   0x6   :  { %v592_v17 = vld [vmem:[%s807_s3] sm:$0xff]   ;;  %v76_v19 = vcombine.high %v463_v13, %v463_v13  ;;  %v589_v23 = vld [vmem:[%s805_s1 + $0x30] sm:$0xff]   ;;  %v590_v25 = vld [vmem:[%s805_s1 + $0x78] sm:$0xff]  }
   0x7   :  { %501 = vmatpush3.bf16.msra.mxu0 %v579_v4  ;;  %537 = vmatpush3.bf16.msra.mxu1 %v592_v17  ;;  %v594_v26 = vld [vmem:[%s807_s3 + $0x10] sm:$0xff]   ;;  %v591_v28 = vld [vmem:[%s805_s1 + $0x38] sm:$0xff]  }
   0x8   :  { %502 = vmatprep.subr.bf16.mxu0 %v580_v5  ;;  %538 = vmatprep.subr.bf16.mxu1 %v630_v2  ;;  %v90_v27 = vrot.slane %v76_v19, %v82_v24  ;;  %v595_v29 = vld [vmem:[%s807_s3 + $0x18] sm:$0xff]  }
   0xa   :  { %221 = vmatprep.mubr.bf16.mxu0 %v90_v27 }
   0xb   :  { %503 = vmatpush3.bf16.msra.mxu0 %v581_v6  ;;  %539 = vmatpush3.bf16.msra.mxu1 %v593_v21 }
   0xc   :  { %504 = vmatprep.subr.bf16.mxu0 %v582_v7  ;;  %540 = vmatprep.subr.bf16.mxu1 %v630_v2 }
   0xf   :  { %505 = vmatpush3.bf16.msra.mxu0 %v583_v8  ;;  %541 = vmatpush3.bf16.msra.mxu1 %v594_v26 }
  0x10   :  { %506 = vmatprep.subr.bf16.mxu0 %v584_v9 }
  0x13   :  { %507 = vmatpush3.bf16.msra.mxu0 %v585_v11 }
  0x14   :  { %508 = vmatprep.subr.bf16.mxu0 %v586_v12 }
  0x17   :  { %509 = vmatpush3.bf16.msra.mxu0 %v587_v18 }
  0x18   :  { %510 = vmatprep.subr.bf16.mxu0 %v588_v22 }
  0x1b   :  { %511 = vmatpush3.bf16.msra.mxu0 %v589_v23 }
  0x1c   :  { %12 = vsyncpa [#allocation3], 0  ;;  %512 = vmatprep.subr.bf16.mxu0 %v590_v25  ;;  %542 = vmatprep.subr.bf16.mxu1 %v630_v2  ;;  %v83_v30 = vrot.slane %v463_v13, %v82_v24  ;;  %v596_v31 = vld [vmem:[%s807_s3 + $0x20] sm:$0xff]   ;;  %v597_v32 = vld [vmem:[%s807_s3 + $0x28] sm:$0xff]   ;;  %vm302_vm0 = vcmask 1043456   ;;  %vm632_vm1 = vmmov 0  }
  0x1d   :  { %543 = vmatpush3.bf16.msra.mxu1 %v595_v29  ;;  %v598_v33 = vld [vmem:[%s807_s3 + $0x30] sm:$0xff]   ;;  %v599_v34 = vld [vmem:[%s807_s3 + $0x38] ss:$0 sps:$4 sm:$0xff]   ;;  %552 = vmatprep.mubr.msk.bf16.mxu1 %vm632_vm1, %v630_v2  ;;  %v600_v36 = vld [vmem:[%s809_s5] sm:$0xff]   ;;  %vm298_vm2 = vcmask 982016   ;;  %vm403_vm3 = vcmask 1041408  }
  0x1e   :  { %544 = vmatprep.subr.bf16.mxu1 %v630_v2  ;;  %v304_v35 = vsel %vm302_vm0, %v599_v34, 0  ;;  %v601_v37 = vld [vmem:[%s809_s5 + $0x8] sm:$0xff]   ;;  %v602_v38 = vld [vmem:[%s809_s5 + $0x10] sm:$0xff]   ;;  %v603_v39 = vld [vmem:[%s809_s5 + $0x18] sm:$0xff]   ;;  %vm399_vm4 = vcmask 687104  }
  0x1f   :  { %513 = vmatpush3.bf16.msra.mxu0 %v591_v28  ;;  %v462_v41 = vld [vmem:[%s806_s2] ss:$0 sm:$0xff]  ;;  %v605_v50 = vld [vmem:[%s809_s5 + $0x28] ss:$0 sps:$4 sm:$0x33]  }
  0x20   :  { %556 = vmatprep.subr.bf16.mxu0 %v630_v2  ;;  %v604_v49 = vld [vmem:[%s809_s5 + $0x20] sm:$0xff]   ;;  %v405_v51 = vsel %vm403_vm3, %v605_v50, 0  ;;  %s633_s5 = smov [#allocation2]  }
  0x21   :  { %545 = vmatpush3.bf16.msra.mxu1 %v596_v31  ;;  %v480_v52 = vld [vmem:[%s808_s4] ss:$0 sm:$0xff]  ;;  %s454_s18 = sshll.u32 %s633_s5, 4  ;;  %s455_s18 = int_to_ptr.vmem [resolvable:$true] %s454_s18 }
  0x22   :  { %222 = vmatmul.mubr.bf16.vlgmr.msra.gmra.mrb[0].mxu0 %v83_v30  ;;  %546 = vmatprep.subr.bf16.mxu1 %v630_v2  ;;  %v490_v60 = vld [vmem:[%s810_s6] ss:$0 sm:$0xff]  ;;  %s606_s4 = scalar_lea.vmem %s455_s18, 32  ;;  %p611_p1 = scmp.lt.s32.totalorder %s455_s18, %s455_s18 }
  0x23   :  { %568 = vmatprep.mubr.msk.bf16.mxu0 %vm632_vm1, %v630_v2  ;;  %557 = vmatpush3.bf16.msra.mxu0 %v600_v36  ;;  %p607_p0 = scmp.ne.s32.totalorder %s455_s18, %s606_s4  ;;  %p612_p2 = scmp.lt.s32.totalorder %s606_s4, %s606_s4 }
  0x24   :  { %558 = vmatprep.subr.bf16.mxu0 %v630_v2 }
  0x25   :  { %547 = vmatpush3.bf16.msra.mxu1 %v597_v32  ;;  %p613_p3 = por %p612_p2, %p611_p1 }
  0x26   :  { %548 = vmatprep.subr.bf16.mxu1 %v630_v2 }
  0x27   :  { %559 = vmatpush3.bf16.msra.mxu0 %v601_v37  ;;  %p614_p4 = pnand %p613_p3, %p607_p0 }
  0x28   :  { %560 = vmatprep.subr.bf16.mxu0 %v630_v2 }
  0x29   :  { %549 = vmatpush3.bf16.msra.mxu1 %v598_v33 }
  0x2a   :  { %550 = vmatprep.subr.bf16.mxu1 %v630_v2 }
  0x2b   :  { %561 = vmatpush3.bf16.msra.mxu0 %v602_v38 }
  0x2c   :  { %562 = vmatprep.subr.bf16.mxu0 %v630_v2 }
  0x2d   :  { %551 = vmatpush3.bf16.msra.mxu1 %v304_v35 }
  0x2f   :  { %563 = vmatpush3.bf16.msra.mxu0 %v603_v39 }
  0x30   :  { %564 = vmatprep.subr.bf16.mxu0 %v630_v2 }
  0x33   :  { %565 = vmatpush3.bf16.msra.mxu0 %v604_v49 }
  0x34   :  { %566 = vmatprep.subr.bf16.mxu0 %v630_v2 }
  0x37   :  { %567 = vmatpush3.bf16.msra.mxu0 %v405_v51 }
  0xf5   :  { %v514_v40 = vpop.f32.mrb[0].mxu0 }
  0xf6   :  { %v515_v42 = vpop.f32.mrb[1].mxu0 }
  0xf7   :  { %v516_v43 = vadd.f32 %v515_v42, %v514_v40  ;;  %v517_v44 = vpop.f32.mrb[2].mxu0 }
  0xf8   :  { %v518_v45 = vpop.f32.mrb[3].mxu0 }
  0xf9   :  { %v224_v46 = vadd.f32 %v516_v43, %v462_v41 }
  0xfb   :  { %v229_v47 = vmax.f32 %v224_v46, 0.0 }
  0xfd   :  { %v230_v48 = vpack.c.bf16 %v229_v47, %v229_v47 }
  0xff   :  { %553 = vmatmul.mubr.msk.bf16.vlgmr.msra.gmra.mrb[0].mxu1 %vm298_vm2, %v230_v48 }
 0x1d2   :  { %v340_v53 = vpop.f32.mrb[0].mxu1 }
 0x1d3   :  { %v341_v54 = vadd.f32 %v480_v52, %v340_v53  ;;  %v554_v55 = vpop.f32.mrb[1].mxu1 }
 0x1d4   :  { %v343_v56 = vpop.f32.mrb[2].mxu1 }
 0x1d5   :  { %v346_v57 = vmax.f32 %v341_v54, 0.0  ;;  %v555_v58 = vpop.f32.mrb[3].mxu1 }
 0x1d7   :  { %v347_v59 = vpack.c.bf16 %v346_v57, %v346_v57 }
 0x1d9   :  { %569 = vmatmul.mubr.msk.bf16.vlgmr.msra.gmra.mrb[4].mxu0 %vm399_vm4, %v347_v59 }
 0x2ac   :  { %v441_v61 = vpop.f32.mrb[4].mxu0 }
 0x2ad   :  { %v442_v62 = vadd.f32 %v490_v60, %v441_v61  ;;  %v570_v63 = vpop.f32.mrb[5].mxu0 }
 0x2ae   :  { %v444_v0 = vpop.f32.mrb[6].mxu0 }
 0x2af   :  { %447 = vst [vmem:[#allocation2] sm:$0x3] %v442_v62  ;;  %v571_v1 = vpop.f32.mrb[7].mxu0 }
 0x2b0   :  { %617 = shalt.err (!%p614_p4)
}
 0x2b1   :  { %s618_s6 = scalar_lea.hbm %s811_s7, 32 }
 0x2b2   :  { %p619_p5 = scmp.ne.s32.totalorder %s811_s7, %s618_s6  ;;  %p622_p6 = scmp.lt.u32.totalorder %s618_s6, %s811_s7 }
 0x2b4   :  { %p624_p7 = pnand %p622_p6, %p619_p5 }
 0x2b6   :  { %627 = shalt.err (!%p624_p7)
}
 0x2b7   :  { %457 = dma.vmem_to_hbm [thread:$0]  %s455_s18, 32, %s811_s7, [#allocation3]  }
 0x2b8   :  { %628 = dma.done.wait [#allocation3], 32  }
 0x2b9   :  { %629 = vsyncadd [#allocation3], 4294967264 }
 0x2ba   :  { %461 = vsyncpa [#allocation3], 1 }

</bundles_post_ra>
